<compile_context>
chip_gen: v7x
topology: tpu7x:2x2x1
jax: 0.10.0
libtpu: 0.0.40
codegen_flags: <defaults>
</compile_context>

<pallas_src>
import functools

import jax
import jax.numpy as jnp
from jax.experimental import pallas as pl
from jax.experimental.pallas import tpu as pltpu


def vae_kernel(x_ref, eps_ref,
               w1_ref, b1_ref,
               wmv_ref, bmv_ref,
               wd1_ref, bd1_ref,
               wd2_ref, bd2_ref,
               out_ref, mv_ref):
    L = eps_ref.shape[-1]
    bf = jnp.bfloat16

    # encoder: Linear(num_items -> hidden) + Tanh.
    # x arrives in f32; cast to bf16 here (cheap VPU work) instead of a wrapper pass.
    h = jnp.tanh(
        jnp.dot(x_ref[...].astype(bf), w1_ref[...],
                preferred_element_type=jnp.float32)
        + b1_ref[...]
    )

    # fused code_mean | code_logvar: one lane-dense (hidden -> 2*latent) matmul
    mv = (
        jnp.dot(h.astype(bf), wmv_ref[...], preferred_element_type=jnp.float32)
        + bmv_ref[...]
    )
    mean = mv[:, :L]
    logvar = mv[:, L:]

    # reparameterize (f32): z = mean + exp(0.5 * logvar) * eps
    z = mean + jnp.exp(0.5 * logvar) * eps_ref[...]

    # decoder: Linear(latent -> hidden), then Linear(hidden -> num_items); no activations
    d1 = (
        jnp.dot(z.astype(bf), wd1_ref[...], preferred_element_type=jnp.float32)
        + bd1_ref[...]
    )
    out = (
        jnp.dot(d1.astype(bf), wd2_ref[...], preferred_element_type=jnp.float32)
        + bd2_ref[...]
    )

    out_ref[...] = out.astype(out_ref.dtype)
    mv_ref[...] = mv          # packed (mean | logvar), lane-dense 2L-wide store


def prepare_params(params):
    """One-time parameter packing (do this once, not per forward call):
    fuse code_mean|code_logvar weights/biases and cast matmul weights to bf16."""
    bf = jnp.bfloat16
    f32 = jnp.float32
    return {
        "w1":  params["w1"].astype(bf),
        "b1":  params["b1"].astype(f32),
        "wmv": jnp.concatenate([params["wm"], params["wv"]], axis=1).astype(bf),
        "bmv": jnp.concatenate([params["bm"], params["bv"]], axis=1).astype(f32),
        "wd1": params["wd1"].astype(bf),
        "bd1": params["bd1"].astype(f32),
        "wd2": params["wd2"].astype(bf),
        "bd2": params["bd2"].astype(f32),
    }


def pick_block_b(batch):
    """Per-chip batch tile: one fused step on single-TC chips (v5e/v6e), two
    parallel 128-row steps on v7x when the batch can't fill two 256-row tiles."""
    try:
        kind = jax.devices()[0].device_kind.lower()
    except Exception:  # pragma: no cover - CPU / interpret fallbacks
        kind = ""
    two_tensorcores = ("v7" in kind) or ("7x" in kind)

    if two_tensorcores and batch >= 256 and (batch // 256) < 2 and batch % 128 == 0:
        return 128                      # both TCs busy at M=128
    blk = min(batch, 256)
    while blk > 1 and batch % blk != 0:
        blk //= 2
    return max(blk, 1)


@functools.partial(jax.jit, static_argnames=("block_b", "recon_dtype"))
def vae_forward(x, eps, packed, block_b=128, recon_dtype=jnp.float32):
    """Fused VAE forward.

    x:      (B, num_items) f32   (cast to bf16 inside the kernel)
    eps:    (B, latent)    f32   reparameterization noise
    packed: output of prepare_params()
    """
    B, N = x.shape
    L = packed["wmv"].shape[1] // 2
    assert B % block_b == 0, "batch must be divisible by block_b"
    # TODO(synk): add a masked tail block for batch sizes not divisible by block_b.

    def act_spec(feat):
        # tile over the batch axis only; feature axis is the full extent
        return pl.BlockSpec((block_b, feat), lambda i: (i, 0))

    def const_spec(shape):
        # whole parameter resident every step (constant block index); single-buffered
        # so it doesn't pay a second VMEM buffer it never uses.
        return pl.BlockSpec(shape, lambda i: tuple(0 for _ in shape),
                            pipeline_mode=pl.Buffered(1))

    in_specs = [
        act_spec(N),                                        # x (f32)
        act_spec(L),                                        # eps (f32)
        const_spec(packed["w1"].shape),  const_spec(packed["b1"].shape),
        const_spec(packed["wmv"].shape), const_spec(packed["bmv"].shape),
        const_spec(packed["wd1"].shape), const_spec(packed["bd1"].shape),
        const_spec(packed["wd2"].shape), const_spec(packed["bd2"].shape),
    ]
    out_specs = [act_spec(N), act_spec(2 * L)]
    out_shape = [
        jax.ShapeDtypeStruct((B, N), recon_dtype),          # reconstruction
        jax.ShapeDtypeStruct((B, 2 * L), jnp.float32),      # packed mean | logvar
    ]

    grid_spec = pltpu.PrefetchScalarGridSpec(
        num_scalar_prefetch=0,
        grid=(B // block_b,),
        in_specs=in_specs,
        out_specs=out_specs,
    )

    out, mv = pl.pallas_call(
        vae_kernel,
        out_shape=out_shape,
        grid_spec=grid_spec,
        compiler_params=pltpu.CompilerParams(
            dimension_semantics=("parallel",),
        ),
    )(x, eps,
      packed["w1"], packed["b1"],
      packed["wmv"], packed["bmv"],
      packed["wd1"], packed["bd1"],
      packed["wd2"], packed["bd2"])

    mean = mv[:, :L]
    logvar = mv[:, L:]
    return out, mean, logvar


def init_params(key, num_items, hidden, latent):
    """Deterministic xavier-uniform weights + uniform[0,1) biases (cf. _init_params).
    Weights stored as (in_features, out_features), i.e. already transposed vs torch."""
    def xavier(k, fan_in, fan_out):
        bound = jnp.sqrt(6.0 / (fan_in + fan_out))
        return jax.random.uniform(k, (fan_in, fan_out), jnp.float32, -bound, bound)

    ks = jax.random.split(key, 10)
    return {
        "w1":  xavier(ks[0], num_items, hidden),
        "b1":  jax.random.uniform(ks[1], (1, hidden), jnp.float32),
        "wm":  xavier(ks[2], hidden, latent),
        "bm":  jax.random.uniform(ks[3], (1, latent), jnp.float32),
        "wv":  xavier(ks[4], hidden, latent),
        "bv":  jax.random.uniform(ks[5], (1, latent), jnp.float32),
        "wd1": xavier(ks[6], latent, hidden),
        "bd1": jax.random.uniform(ks[7], (1, hidden), jnp.float32),
        "wd2": xavier(ks[8], hidden, num_items),
        "bd2": jax.random.uniform(ks[9], (1, num_items), jnp.float32),
    }


def vae_reference(x, eps, p):
    """Plain-JAX reference mirroring the kernel's dtype policy
    (bf16 matmul inputs, f32 accumulation, f32 elementwise)."""
    bf = jnp.bfloat16

    def mm(a, w):
        return jnp.dot(a.astype(bf), w.astype(bf),
                       preferred_element_type=jnp.float32)

    h = jnp.tanh(mm(x, p["w1"]) + p["b1"])
    mean = mm(h, p["wm"]) + p["bm"]
    logvar = mm(h, p["wv"]) + p["bv"]
    z = mean + jnp.exp(0.5 * logvar) * eps
    d1 = mm(z, p["wd1"]) + p["bd1"]
    out = mm(d1, p["wd2"]) + p["bd2"]
    return out, mean, logvar


if __name__ == "__main__":
    # Shapes consistent with the module: VAE(num_items=256, latent_dim=64,
    # hidden_layers=[128]); batch 256.  block_b is picked per chip:
    #   v5e/v6e -> 256 (single fused step), v7x -> 128 (one step per TensorCore).
    B, NUM_ITEMS, HIDDEN, LATENT = 256, 256, 128, 64

    key = jax.random.PRNGKey(0)
    kx, keps, kp = jax.random.split(key, 3)

    x = jax.random.uniform(kx, (B, NUM_ITEMS), jnp.float32)   # implicit-feedback rows
    eps = jax.random.normal(keps, (B, LATENT), jnp.float32)   # reparameterization noise
    params = init_params(kp, NUM_ITEMS, HIDDEN, LATENT)

    packed = jax.block_until_ready(prepare_params(params))    # one-time packing
    block_b = pick_block_b(B)

    out, mean, logvar = jax.block_until_ready(
        vae_forward(x, eps, packed, block_b=block_b)
    )

    # sanity check against the plain-JAX reference (same bf16 matmul policy)
    ref_out, ref_mean, ref_logvar = vae_reference(x, eps, params)
    assert jnp.allclose(out, ref_out, atol=2e-2, rtol=2e-2)
    assert jnp.allclose(mean, ref_mean, atol=2e-2, rtol=2e-2)
    assert jnp.allclose(logvar, ref_logvar, atol=2e-2, rtol=2e-2)

    # TODO(synk): denosing=True training path (add_noise + nn.Dropout) not exercised;
    # it is off by default in the module constructor.
    print("KERNEL_OK")
</pallas_src>

<mosaic_0001>
module attributes {stable_mosaic.version = 11 : i64} {
  func.func @vae_kernel(%arg0: i32, %arg1: memref<256x256xf32, #tpu.memory_space<vmem>>, %arg2: memref<256x64xf32, #tpu.memory_space<vmem>>, %arg3: memref<256x128xbf16, #tpu.memory_space<vmem>>, %arg4: memref<1x128xf32, #tpu.memory_space<vmem>>, %arg5: memref<128x128xbf16, #tpu.memory_space<vmem>>, %arg6: memref<1x128xf32, #tpu.memory_space<vmem>>, %arg7: memref<64x128xbf16, #tpu.memory_space<vmem>>, %arg8: memref<1x128xf32, #tpu.memory_space<vmem>>, %arg9: memref<128x256xbf16, #tpu.memory_space<vmem>>, %arg10: memref<1x256xf32, #tpu.memory_space<vmem>>, %arg11: memref<256x256xf32, #tpu.memory_space<vmem>>, %arg12: memref<256x128xf32, #tpu.memory_space<vmem>>) attributes {dimension_semantics = [#tpu.dimension_semantics<parallel>], iteration_bounds = array<i64: 1>, scalar_prefetch = 0 : i64, scratch_operands = 0 : i64, tpu.core_type = #tpu.core_type<tc>, window_params = [{transform_indices = @transform_0, window_bounds = array<i64: 256, 256>}, {transform_indices = @transform_1, window_bounds = array<i64: 256, 64>}, {pipeline_mode = #tpu.pipeline_mode<synchronous>, transform_indices = @transform_2, window_bounds = array<i64: 256, 128>}, {pipeline_mode = #tpu.pipeline_mode<synchronous>, transform_indices = @transform_3, window_bounds = array<i64: 1, 128>}, {pipeline_mode = #tpu.pipeline_mode<synchronous>, transform_indices = @transform_4, window_bounds = array<i64: 128, 128>}, {pipeline_mode = #tpu.pipeline_mode<synchronous>, transform_indices = @transform_5, window_bounds = array<i64: 1, 128>}, {pipeline_mode = #tpu.pipeline_mode<synchronous>, transform_indices = @transform_6, window_bounds = array<i64: 64, 128>}, {pipeline_mode = #tpu.pipeline_mode<synchronous>, transform_indices = @transform_7, window_bounds = array<i64: 1, 128>}, {pipeline_mode = #tpu.pipeline_mode<synchronous>, transform_indices = @transform_8, window_bounds = array<i64: 128, 256>}, {pipeline_mode = #tpu.pipeline_mode<synchronous>, transform_indices = @transform_9, window_bounds = array<i64: 1, 256>}, {transform_indices = @transform_10, window_bounds = array<i64: 256, 256>}, {transform_indices = @transform_11, window_bounds = array<i64: 256, 128>}]} {
    %c0 = arith.constant 0 : index
    %c0_0 = arith.constant 0 : index
    %0 = vector.load %arg1[%c0, %c0_0] : memref<256x256xf32, #tpu.memory_space<vmem>>, vector<256x256xf32>
    %1 = arith.truncf %0 : vector<256x256xf32> to vector<256x256xbf16>
    %c0_1 = arith.constant 0 : index
    %c0_2 = arith.constant 0 : index
    %2 = vector.load %arg3[%c0_1, %c0_2] : memref<256x128xbf16, #tpu.memory_space<vmem>>, vector<256x128xbf16>
    %cst = arith.constant dense<0.000000e+00> : vector<256x128xf32>
    %3 = tpu.matmul %1, %2, %cst {dimension_numbers = #tpu.dot_dimension_numbers<[1], [0], [0], [1], [0, 0, 1, 1], [], []>} : vector<256x256xbf16>, vector<256x128xbf16>, vector<256x128xf32> -> vector<256x128xf32>
    %c0_3 = arith.constant 0 : index
    %c0_4 = arith.constant 0 : index
    %4 = vector.load %arg4[%c0_3, %c0_4] : memref<1x128xf32, #tpu.memory_space<vmem>>, vector<1x128xf32>
    %5 = vector.broadcast %4 : vector<1x128xf32> to vector<256x128xf32>
    %6 = arith.addf %3, %5 : vector<256x128xf32>
    %7 = math.tanh %6 : vector<256x128xf32>
    %8 = arith.truncf %7 : vector<256x128xf32> to vector<256x128xbf16>
    %c0_5 = arith.constant 0 : index
    %c0_6 = arith.constant 0 : index
    %9 = vector.load %arg5[%c0_5, %c0_6] : memref<128x128xbf16, #tpu.memory_space<vmem>>, vector<128x128xbf16>
    %cst_7 = arith.constant dense<0.000000e+00> : vector<256x128xf32>
    %10 = tpu.matmul %8, %9, %cst_7 {dimension_numbers = #tpu.dot_dimension_numbers<[1], [0], [0], [1], [0, 0, 1, 1], [], []>} : vector<256x128xbf16>, vector<128x128xbf16>, vector<256x128xf32> -> vector<256x128xf32>
    %c0_8 = arith.constant 0 : index
    %c0_9 = arith.constant 0 : index
    %11 = vector.load %arg6[%c0_8, %c0_9] : memref<1x128xf32, #tpu.memory_space<vmem>>, vector<1x128xf32>
    %12 = vector.broadcast %11 : vector<1x128xf32> to vector<256x128xf32>
    %13 = arith.addf %10, %12 : vector<256x128xf32>
    %14 = vector.extract_strided_slice %13 {offsets = [0, 0], sizes = [256, 64], strides = [1, 1]} : vector<256x128xf32> to vector<256x64xf32>
    %15 = vector.extract_strided_slice %13 {offsets = [0, 64], sizes = [256, 64], strides = [1, 1]} : vector<256x128xf32> to vector<256x64xf32>
    %cst_10 = arith.constant 5.000000e-01 : f32
    %16 = vector.broadcast %cst_10 : f32 to vector<256x64xf32>
    %17 = arith.mulf %16, %15 : vector<256x64xf32>
    %18 = math.exp %17 : vector<256x64xf32>
    %c0_11 = arith.constant 0 : index
    %c0_12 = arith.constant 0 : index
    %19 = vector.load %arg2[%c0_11, %c0_12] : memref<256x64xf32, #tpu.memory_space<vmem>>, vector<256x64xf32>
    %20 = arith.mulf %18, %19 : vector<256x64xf32>
    %21 = arith.addf %14, %20 : vector<256x64xf32>
    %22 = arith.truncf %21 : vector<256x64xf32> to vector<256x64xbf16>
    %c0_13 = arith.constant 0 : index
    %c0_14 = arith.constant 0 : index
    %23 = vector.load %arg7[%c0_13, %c0_14] : memref<64x128xbf16, #tpu.memory_space<vmem>>, vector<64x128xbf16>
    %cst_15 = arith.constant dense<0.000000e+00> : vector<256x128xf32>
    %24 = tpu.matmul %22, %23, %cst_15 {dimension_numbers = #tpu.dot_dimension_numbers<[1], [0], [0], [1], [0, 0, 1, 1], [], []>} : vector<256x64xbf16>, vector<64x128xbf16>, vector<256x128xf32> -> vector<256x128xf32>
    %c0_16 = arith.constant 0 : index
    %c0_17 = arith.constant 0 : index
    %25 = vector.load %arg8[%c0_16, %c0_17] : memref<1x128xf32, #tpu.memory_space<vmem>>, vector<1x128xf32>
    %26 = vector.broadcast %25 : vector<1x128xf32> to vector<256x128xf32>
    %27 = arith.addf %24, %26 : vector<256x128xf32>
    %28 = arith.truncf %27 : vector<256x128xf32> to vector<256x128xbf16>
    %c0_18 = arith.constant 0 : index
    %c0_19 = arith.constant 0 : index
    %29 = vector.load %arg9[%c0_18, %c0_19] : memref<128x256xbf16, #tpu.memory_space<vmem>>, vector<128x256xbf16>
    %cst_20 = arith.constant dense<0.000000e+00> : vector<256x256xf32>
    %30 = tpu.matmul %28, %29, %cst_20 {dimension_numbers = #tpu.dot_dimension_numbers<[1], [0], [0], [1], [0, 0, 1, 1], [], []>} : vector<256x128xbf16>, vector<128x256xbf16>, vector<256x256xf32> -> vector<256x256xf32>
    %c0_21 = arith.constant 0 : index
    %c0_22 = arith.constant 0 : index
    %31 = vector.load %arg10[%c0_21, %c0_22] : memref<1x256xf32, #tpu.memory_space<vmem>>, vector<1x256xf32>
    %32 = vector.broadcast %31 : vector<1x256xf32> to vector<256x256xf32>
    %33 = arith.addf %30, %32 : vector<256x256xf32>
    %c0_23 = arith.constant 0 : index
    %c0_24 = arith.constant 0 : index
    %34 = vector.load %arg11[%c0_23, %c0_24] : memref<256x256xf32, #tpu.memory_space<vmem>>, vector<256x256xf32>
    tpu.vector_store %arg11[%c0_23, %c0_24], %33 {strides = array<i32>} : memref<256x256xf32, #tpu.memory_space<vmem>>, vector<256x256xf32>,
    %c0_25 = arith.constant 0 : index
    %c0_26 = arith.constant 0 : index
    %35 = vector.load %arg12[%c0_25, %c0_26] : memref<256x128xf32, #tpu.memory_space<vmem>>, vector<256x128xf32>
    tpu.vector_store %arg12[%c0_25, %c0_26], %13 {strides = array<i32>} : memref<256x128xf32, #tpu.memory_space<vmem>>, vector<256x128xf32>,
    return
  }
  func.func @transform_0(%arg0: i32) -> (i32, i32) {
    %c0_i32 = arith.constant 0 : i32
    %c0_i32_0 = arith.constant 0 : i32
    return %arg0, %c0_i32 : i32, i32
  }
  func.func @transform_1(%arg0: i32) -> (i32, i32) {
    %c0_i32 = arith.constant 0 : i32
    %c0_i32_0 = arith.constant 0 : i32
    return %arg0, %c0_i32 : i32, i32
  }
  func.func @transform_2(%arg0: i32) -> (i32, i32) {
    %c0_i32 = arith.constant 0 : i32
    %c0_i32_0 = arith.constant 0 : i32
    %c0_i32_1 = arith.constant 0 : i32
    return %c0_i32, %c0_i32_0 : i32, i32
  }
  func.func @transform_3(%arg0: i32) -> (i32, i32) {
    %c0_i32 = arith.constant 0 : i32
    %c0_i32_0 = arith.constant 0 : i32
    %c0_i32_1 = arith.constant 0 : i32
    return %c0_i32, %c0_i32_0 : i32, i32
  }
  func.func @transform_4(%arg0: i32) -> (i32, i32) {
    %c0_i32 = arith.constant 0 : i32
    %c0_i32_0 = arith.constant 0 : i32
    %c0_i32_1 = arith.constant 0 : i32
    return %c0_i32, %c0_i32_0 : i32, i32
  }
  func.func @transform_5(%arg0: i32) -> (i32, i32) {
    %c0_i32 = arith.constant 0 : i32
    %c0_i32_0 = arith.constant 0 : i32
    %c0_i32_1 = arith.constant 0 : i32
    return %c0_i32, %c0_i32_0 : i32, i32
  }
  func.func @transform_6(%arg0: i32) -> (i32, i32) {
    %c0_i32 = arith.constant 0 : i32
    %c0_i32_0 = arith.constant 0 : i32
    %c0_i32_1 = arith.constant 0 : i32
    return %c0_i32, %c0_i32_0 : i32, i32
  }
  func.func @transform_7(%arg0: i32) -> (i32, i32) {
    %c0_i32 = arith.constant 0 : i32
    %c0_i32_0 = arith.constant 0 : i32
    %c0_i32_1 = arith.constant 0 : i32
    return %c0_i32, %c0_i32_0 : i32, i32
  }
  func.func @transform_8(%arg0: i32) -> (i32, i32) {
    %c0_i32 = arith.constant 0 : i32
    %c0_i32_0 = arith.constant 0 : i32
    %c0_i32_1 = arith.constant 0 : i32
    return %c0_i32, %c0_i32_0 : i32, i32
  }
  func.func @transform_9(%arg0: i32) -> (i32, i32) {
    %c0_i32 = arith.constant 0 : i32
    %c0_i32_0 = arith.constant 0 : i32
    %c0_i32_1 = arith.constant 0 : i32
    return %c0_i32, %c0_i32_0 : i32, i32
  }
  func.func @transform_10(%arg0: i32) -> (i32, i32) {
    %c0_i32 = arith.constant 0 : i32
    %c0_i32_0 = arith.constant 0 : i32
    return %arg0, %c0_i32 : i32, i32
  }
  func.func @transform_11(%arg0: i32) -> (i32, i32) {
    %c0_i32 = arith.constant 0 : i32
    %c0_i32_0 = arith.constant 0 : i32
    return %arg0, %c0_i32 : i32, i32
  }
}

</mosaic_0001>

<bundles_post_ra>
// kernel: vae_forward.1
= control target key start
LH: loop header
LB: loop body
LE: loop exit
PB: predicated region body
PF: predicated region fallthrough
CT: control target
= control target key end

     0   :  { %17 = vsyncpa [#allocation3], 0  ;;  %s3329_s0 = inlined_call_operand.hbm [shape: f32[256,256], index: 0, kind: input, shape index: {}]   ;;  %s3330_s1 = inlined_call_operand.vmem [shape: f32[256,64], index: 1, kind: input, shape index: {}]   ;;  %s3331_s2 = inlined_call_operand.vmem [shape: bf16[256,128], index: 2, kind: input, shape index: {}]   ;;  %s3332_s3 = inlined_call_operand.vmem [shape: f32[1,128], index: 3, kind: input, shape index: {}]   ;;  %s3333_s4 = inlined_call_operand.vmem [shape: bf16[128,128], index: 4, kind: input, shape index: {}]   ;;  %s3334_s5 = inlined_call_operand.vmem [shape: f32[1,128], index: 5, kind: input, shape index: {}]   ;;  %s3335_s6 = inlined_call_operand.vmem [shape: bf16[64,128], index: 6, kind: input, shape index: {}]   ;;  %s3336_s7 = inlined_call_operand.vmem [shape: f32[1,128], index: 7, kind: input, shape index: {}]   ;;  %s3337_s8 = inlined_call_operand.vmem [shape: bf16[128,256], index: 8, kind: input, shape index: {}]   ;;  %s3338_s9 = inlined_call_operand.vmem [shape: f32[1,256], index: 9, kind: input, shape index: {}]   ;;  %s3339_s10 = inlined_call_operand.hbm [shape: f32[256,256], index: 10, kind: output, shape index: {0}]   ;;  %s3340_s11 = inlined_call_operand.vmem [shape: f32[256,128], index: 11, kind: output, shape index: {1}]  }
   0x1   :  { %18 = vsyncpa [#allocation4], 0  ;;  %s2429_s17 = smov [#allocation2]   ;;  %s2381_s21 = scalar_lea.hbm %s3329_s0, 8192 }
   0x2   :  { %s24_s18 = sshll.u32 %s2429_s17, 4  ;;  %p2382_p0 = scmp.ne.s32.totalorder %s3329_s0, %s2381_s21  ;;  %s25_s18 = int_to_ptr.vmem [resolvable:$true] %s24_s18 }
   0x3   :  { %p2385_p1 = scmp.lt.u32.totalorder %s2381_s21, %s3329_s0 }
   0x5   :  { %p2387_p2 = pnand %p2385_p1, %p2382_p0 }
   0x7   :  { %2390 = shalt.err (!%p2387_p2)
}
   0x8   :  { %s2391_s26 = scalar_lea.vmem %s25_s18, 8192  ;;  %p2396_p4 = scmp.lt.s32.totalorder %s25_s18, %s25_s18 }
   0x9   :  { %p2392_p3 = scmp.ne.s32.totalorder %s25_s18, %s2391_s26  ;;  %p2397_p5 = scmp.lt.s32.totalorder %s2391_s26, %s2391_s26 }
   0xb   :  { %p2398_p6 = por %p2397_p5, %p2396_p4 }
   0xd   :  { %p2399_p7 = pnand %p2398_p6, %p2392_p3 }
   0xf   :  { %2402 = shalt.err (!%p2399_p7)
}
  0x10   :  { %s2430_s27 = smov 256   ;;  %s2431_s28 = smov 16  }
  0x11   :  { %30 = dma.hbm_to_vmem [thread:$0]  %s3329_s0, 8192, %s25_s18, [#allocation3], %s2430_s27, %s2430_s27, %s2431_s28  }
  0x12   :  { %2425 = dma.done.wait [#allocation3], 8192  }
  0x13   :  { %2426 = vsyncadd [#allocation3], 4294959104  ;;  %v2201_v0 = vld [vmem:[%s3331_s2 + $0x40] sm:$0xff]   ;;  %v2203_v2 = vld [vmem:[%s3331_s2 + $0x48] sm:$0xff]   ;;  %s2432_s25 = smov 64   ;;  %vm1228_vm0 = vcmask 523264  }
  0x14   :  { %v2202_v1 = vld [vmem:[%s3331_s2] sm:$0xff]   ;;  %1935 = vmatprep.subr.bf16.mxu0 %v2201_v0  ;;  %2179 = vmatprep.subr.bf16.mxu1 %v2201_v0  ;;  %v2204_v3 = vld [vmem:[%s3331_s2 + $0x8] sm:$0xff]   ;;  %v2205_v4 = vld [vmem:[%s3331_s2 + $0x50] sm:$0xff]  }
  0x15   :  { %1936 = vmatpush3.bf16.msra.mxu0 %v2202_v1  ;;  %2187 = vmatpush3.bf16.msra.mxu1 %v2202_v1  ;;  %v2206_v5 = vld [vmem:[%s3331_s2 + $0x10] sm:$0xff]   ;;  %v2207_v6 = vld [vmem:[%s3331_s2 + $0x58] sm:$0xff]   ;;  %v2209_v8 = vld [vmem:[%s3331_s2 + $0x60] sm:$0xff]  }
  0x16   :  { %1937 = vmatprep.subr.bf16.mxu0 %v2203_v2  ;;  %2180 = vmatprep.subr.bf16.mxu1 %v2203_v2  ;;  %v2208_v7 = vld [vmem:[%s3331_s2 + $0x18] sm:$0xff]   ;;  %v2210_v9 = vld [vmem:[%s3331_s2 + $0x20] sm:$0xff]   ;;  %v2211_v10 = vld [vmem:[%s3331_s2 + $0x68] sm:$0xff]  }
  0x17   :  { %v54_v11 = vld [vmem:[#allocation2 + $0x8] sm:$0xff]  ;;  %v56_v12 = vld [vmem:[#allocation2 + $0x18] sm:$0xff]  ;;  %v2213_v15 = vld [vmem:[%s3331_s2 + $0x70] sm:$0xff]  }
  0x18   :  { %v118_v13 = vpack.c.bf16 %v56_v12, %v54_v11  ;;  %v2212_v14 = vld [vmem:[%s3331_s2 + $0x28] sm:$0xff]   ;;  %v2214_v16 = vld [vmem:[%s3331_s2 + $0x30] sm:$0xff]   ;;  %v2215_v17 = vld [vmem:[%s3331_s2 + $0x78] sm:$0xff]  }
  0x19   :  { %1938 = vmatpush3.bf16.msra.mxu0 %v2204_v3  ;;  %2188 = vmatpush3.bf16.msra.mxu1 %v2204_v3  ;;  %v2216_v18 = vld [vmem:[%s3331_s2 + $0x38] sm:$0xff]   ;;  %v53_v19 = vld [vmem:[#allocation2] sm:$0xff]  ;;  %v86_v20 = vld [vmem:[#allocation2 + $0x108] sm:$0xff] }
  0x1a   :  { %1939 = vmatprep.subr.bf16.mxu0 %v2205_v4  ;;  %2181 = vmatprep.subr.bf16.mxu1 %v2205_v4  ;;  %v55_v21 = vld [vmem:[#allocation2 + $0x10] sm:$0xff]  ;;  %v58_v22 = vld [vmem:[#allocation2 + $0x28] sm:$0xff]  ;;  %v88_v23 = vld [vmem:[#allocation2 + $0x118] sm:$0xff] }
  0x1b   :  { %316 = vmatprep.mubr.bf16.mxu0 %v118_v13  ;;  %v60_v24 = vld [vmem:[#allocation2 + $0x38] sm:$0xff]  ;;  %v134_v25 = vpack.c.bf16 %v88_v23, %v86_v20  ;;  %v85_v26 = vld [vmem:[#allocation2 + $0x100] sm:$0xff]  ;;  %v87_v27 = vld [vmem:[#allocation2 + $0x110] sm:$0xff]  ;;  %v117_v30 = vpack.c.bf16 %v55_v21, %v53_v19 }
  0x1c   :  { %v90_v28 = vld [vmem:[#allocation2 + $0x128] sm:$0xff]  ;;  %v92_v29 = vld [vmem:[#allocation2 + $0x138] sm:$0xff]  ;;  %v120_v31 = vpack.c.bf16 %v60_v24, %v58_v22  ;;  %v133_v32 = vpack.c.bf16 %v87_v27, %v85_v26  ;;  %v57_v34 = vld [vmem:[#allocation2 + $0x20] sm:$0xff] }
  0x1d   :  { %1940 = vmatpush3.bf16.msra.mxu0 %v2206_v5  ;;  %2189 = vmatpush3.bf16.msra.mxu1 %v2206_v5  ;;  %v136_v33 = vpack.c.bf16 %v92_v29, %v90_v28  ;;  %v59_v35 = vld [vmem:[#allocation2 + $0x30] sm:$0xff]  ;;  %v62_v36 = vld [vmem:[#allocation2 + $0x48] sm:$0xff]  ;;  %v64_v37 = vld [vmem:[#allocation2 + $0x58] sm:$0xff] }
  0x1e   :  { %1941 = vmatprep.subr.bf16.mxu0 %v2207_v6  ;;  %2182 = vmatprep.subr.bf16.mxu1 %v2207_v6  ;;  %v89_v38 = vld [vmem:[#allocation2 + $0x120] sm:$0xff]  ;;  %v91_v39 = vld [vmem:[#allocation2 + $0x130] sm:$0xff]  ;;  %v94_v40 = vld [vmem:[#allocation2 + $0x148] sm:$0xff]  ;;  %v119_v42 = vpack.c.bf16 %v59_v35, %v57_v34  ;;  %v122_v44 = vpack.c.bf16 %v64_v37, %v62_v36 }
  0x1f   :  { %380 = vmatprep.mubr.bf16.mxu1 %v134_v25  ;;  %v96_v41 = vld [vmem:[#allocation2 + $0x158] sm:$0xff]  ;;  %v2217_v43 = vld [vmem:[%s3333_s4] sm:$0xff]   ;;  %v135_v45 = vpack.c.bf16 %v91_v39, %v89_v38  ;;  %v2218_v46 = vld [vmem:[%s3333_s4 + $0x8] sm:$0xff]  }
  0x20   :  { %v138_v47 = vpack.c.bf16 %v96_v41, %v94_v40  ;;  %v61_v48 = vld [vmem:[#allocation2 + $0x40] sm:$0xff]  ;;  %v63_v49 = vld [vmem:[#allocation2 + $0x50] sm:$0xff]  ;;  %v66_v50 = vld [vmem:[#allocation2 + $0x68] sm:$0xff] }
  0x21   :  { %1942 = vmatpush3.bf16.msra.mxu0 %v2208_v7  ;;  %2190 = vmatpush3.bf16.msra.mxu1 %v2208_v7  ;;  %v68_v51 = vld [vmem:[#allocation2 + $0x78] sm:$0xff]  ;;  %v93_v52 = vld [vmem:[#allocation2 + $0x140] sm:$0xff]  ;;  %v95_v53 = vld [vmem:[#allocation2 + $0x150] sm:$0xff]  ;;  %v121_v58 = vpack.c.bf16 %v63_v49, %v61_v48 }
  0x22   :  { %1943 = vmatprep.subr.bf16.mxu0 %v2209_v8  ;;  %2183 = vmatprep.subr.bf16.mxu1 %v2209_v8  ;;  %v2219_v54 = vld [vmem:[%s3333_s4 + $0x10] sm:$0xff]   ;;  %v98_v55 = vld [vmem:[#allocation2 + $0x168] sm:$0xff]  ;;  %v100_v56 = vld [vmem:[#allocation2 + $0x178] sm:$0xff]  ;;  %v124_v59 = vpack.c.bf16 %v68_v51, %v66_v50  ;;  %v137_v60 = vpack.c.bf16 %v95_v53, %v93_v52 }
  0x23   :  { %v2220_v57 = vld [vmem:[%s3333_s4 + $0x18] sm:$0xff]   ;;  %v140_v61 = vpack.c.bf16 %v100_v56, %v98_v55  ;;  %v2221_v62 = vld [vmem:[%s3333_s4 + $0x20] sm:$0xff]   ;;  %v67_v0 = vld [vmem:[#allocation2 + $0x70] sm:$0xff] }
  0x24   :  { %v65_v63 = vld [vmem:[#allocation2 + $0x60] sm:$0xff]  ;;  %v70_v1 = vld [vmem:[#allocation2 + $0x88] sm:$0xff]  ;;  %v72_v2 = vld [vmem:[#allocation2 + $0x98] sm:$0xff] }
  0x25   :  { %1944 = vmatpush3.bf16.msra.mxu0 %v2210_v9  ;;  %2191 = vmatpush3.bf16.msra.mxu1 %v2210_v9  ;;  %v97_v3 = vld [vmem:[#allocation2 + $0x160] sm:$0xff]  ;;  %v99_v4 = vld [vmem:[#allocation2 + $0x170] sm:$0xff]  ;;  %v102_v5 = vld [vmem:[#allocation2 + $0x188] sm:$0xff]  ;;  %v123_v7 = vpack.c.bf16 %v67_v0, %v65_v63  ;;  %v126_v8 = vpack.c.bf16 %v72_v2, %v70_v1 }
  0x26   :  { %1945 = vmatprep.subr.bf16.mxu0 %v2211_v10  ;;  %2184 = vmatprep.subr.bf16.mxu1 %v2211_v10  ;;  %v104_v6 = vld [vmem:[#allocation2 + $0x198] sm:$0xff]  ;;  %v139_v9 = vpack.c.bf16 %v99_v4, %v97_v3  ;;  %v69_v11 = vld [vmem:[#allocation2 + $0x80] sm:$0xff]  ;;  %v71_v12 = vld [vmem:[#allocation2 + $0x90] sm:$0xff] }
  0x27   :  { %v142_v10 = vpack.c.bf16 %v104_v6, %v102_v5  ;;  %v74_v13 = vld [vmem:[#allocation2 + $0xa8] sm:$0xff]  ;;  %v125_v19 = vpack.c.bf16 %v71_v12, %v69_v11  ;;  %v73_v23 = vld [vmem:[#allocation2 + $0xa0] sm:$0xff]  ;;  %v75_v24 = vld [vmem:[#allocation2 + $0xb0] sm:$0xff] }
  0x28   :  { %v78_v25 = vld [vmem:[#allocation2 + $0xc8] sm:$0xff]  ;;  %v80_v26 = vld [vmem:[#allocation2 + $0xd8] sm:$0xff]  ;;  %v105_v27 = vld [vmem:[#allocation2 + $0x1a0] sm:$0xff] }
  0x29   :  { %1946 = vmatpush3.bf16.msra.mxu0 %v2212_v14  ;;  %2192 = vmatpush3.bf16.msra.mxu1 %v2212_v14  ;;  %v76_v14 = vld [vmem:[#allocation2 + $0xb8] sm:$0xff]  ;;  %v107_v28 = vld [vmem:[#allocation2 + $0x1b0] sm:$0xff]  ;;  %v110_v29 = vld [vmem:[#allocation2 + $0x1c8] sm:$0xff] }
  0x2a   :  { %1947 = vmatprep.subr.bf16.mxu0 %v2213_v15  ;;  %2185 = vmatprep.subr.bf16.mxu1 %v2213_v15  ;;  %v101_v15 = vld [vmem:[#allocation2 + $0x180] sm:$0xff]  ;;  %v128_v20 = vpack.c.bf16 %v76_v14, %v74_v13  ;;  %v79_v36 = vld [vmem:[#allocation2 + $0xd0] sm:$0xff]  ;;  %v82_v37 = vld [vmem:[#allocation2 + $0xe8] sm:$0xff] }
  0x2b   :  { %v77_v35 = vld [vmem:[#allocation2 + $0xc0] sm:$0xff]  ;;  %v84_v38 = vld [vmem:[#allocation2 + $0xf8] sm:$0xff]  ;;  %v111_v40 = vld [vmem:[#allocation2 + $0x1d0] sm:$0xff] }
  0x2c   :  { %v109_v39 = vld [vmem:[#allocation2 + $0x1c0] sm:$0xff]  ;;  %v114_v41 = vld [vmem:[#allocation2 + $0x1e8] sm:$0xff]  ;;  %v83_v48 = vld [vmem:[#allocation2 + $0xf0] sm:$0xff] }
  0x2d   :  { %1948 = vmatpush3.bf16.msra.mxu0 %v2214_v16  ;;  %2193 = vmatpush3.bf16.msra.mxu1 %v2214_v16  ;;  %v103_v16 = vld [vmem:[#allocation2 + $0x190] sm:$0xff]  ;;  %v113_v49 = vld [vmem:[#allocation2 + $0x1e0] sm:$0xff]  ;;  %v2222_v53 = vld [vmem:[%s3333_s4 + $0x28] sm:$0xff]  }
  0x2e   :  { %1949 = vmatprep.subr.bf16.mxu0 %v2215_v17  ;;  %2186 = vmatprep.subr.bf16.mxu1 %v2215_v17  ;;  %v106_v17 = vld [vmem:[#allocation2 + $0x1a8] sm:$0xff]  ;;  %v141_v21 = vpack.c.bf16 %v103_v16, %v101_v15  ;;  %v115_v50 = vld [vmem:[#allocation2 + $0x1f0] sm:$0xff]  ;;  %v2224_v55 = vld [vmem:[%s3333_s4 + $0x38] sm:$0xff]  }
  0x2f   :  { %v147_v52 = vpack.c.bf16 %v115_v50, %v113_v49  ;;  %v823_v56 = vld [vmem:[%s3330_s1 + $0x10] sm:$0xff]  ;;  %v828_v63 = vld [vmem:[%s3330_s1 + $0x38] sm:$0xff]  ;;  %v829_v0 = vld [vmem:[%s3330_s1 + $0x40] sm:$0xff] }
  0x30   :  { %889 = vrot.lane.b32.xlu1 %v823_v56, %s2432_s25  ;;  %v830_v1 = vld [vmem:[%s3330_s1 + $0x48] sm:$0xff]  ;;  %v831_v2 = vld [vmem:[%s3330_s1 + $0x50] sm:$0xff]  ;;  %v832_v3 = vld [vmem:[%s3330_s1 + $0x58] sm:$0xff] }
  0x31   :  { %1950 = vmatpush3.bf16.msra.mxu0 %v2216_v18  ;;  %2194 = vmatpush3.bf16.msra.mxu1 %v2216_v18  ;;  %v108_v18 = vld [vmem:[#allocation2 + $0x1b8] sm:$0xff]  ;;  %v833_v4 = vld [vmem:[%s3330_s1 + $0x60] sm:$0xff]  ;;  %v834_v5 = vld [vmem:[%s3330_s1 + $0x68] sm:$0xff] }
  0x32   :  { %2091 = vmatprep.subr.bf16.mxu1 %v2217_v43  ;;  %v144_v22 = vpack.c.bf16 %v108_v18, %v106_v17  ;;  %v835_v6 = vld [vmem:[%s3330_s1 + $0x70] sm:$0xff] }
  0x34   :  { %317 = vmatmul.mubr.bf16.vlgmr.msra.gmra.mrb[0].mxu0 %v117_v30  ;;  %381 = vmatmul.mubr.bf16.vlgmr.msra.gmra.mrb[0].mxu1 %v133_v32  ;;  %v112_v30 = vld [vmem:[#allocation2 + $0x1d8] sm:$0xff]  ;;  %v130_v32 = vpack.c.bf16 %v80_v26, %v78_v25 }
  0x35   :  { %324 = vmatprep.mubr.bf16.mxu0 %v120_v31  ;;  %388 = vmatprep.mubr.bf16.mxu1 %v136_v33  ;;  %v127_v31 = vpack.c.bf16 %v75_v24, %v73_v23  ;;  %v143_v33 = vpack.c.bf16 %v107_v28, %v105_v27  ;;  %v146_v34 = vpack.c.bf16 %v112_v30, %v110_v29 }
  0x36   :  { %2092 = vmatpush3.bf16.msra.mxu1 %v2217_v43  ;;  %v129_v43 = vpack.c.bf16 %v79_v36, %v77_v35 }
  0x37   :  { %2093 = vmatprep.subr.bf16.mxu1 %v2218_v46 }
  0x3a   :  { %2094 = vmatpush3.bf16.msra.mxu1 %v2218_v46 }
  0x3b   :  { %2095 = vmatprep.subr.bf16.mxu1 %v2219_v54 }
  0x3c   :  { %325 = vmatmul.mubr.bf16.gmra.mrb[4].mxu0 %v119_v42  ;;  %389 = vmatmul.mubr.bf16.gmra.mrb[4].mxu1 %v135_v45  ;;  %v116_v42 = vld [vmem:[#allocation2 + $0x1f8] sm:$0xff]  ;;  %v145_v45 = vpack.c.bf16 %v111_v40, %v109_v39 }
  0x3d   :  { %332 = vmatprep.mubr.bf16.mxu0 %v122_v44  ;;  %396 = vmatprep.mubr.bf16.mxu1 %v138_v47  ;;  %v132_v44 = vpack.c.bf16 %v84_v38, %v82_v37  ;;  %v148_v46 = vpack.c.bf16 %v116_v42, %v114_v41  ;;  %v81_v47 = vld [vmem:[#allocation2 + $0xe0] sm:$0xff] }
  0x3e   :  { %2096 = vmatpush3.bf16.msra.mxu1 %v2219_v54  ;;  %v131_v51 = vpack.c.bf16 %v83_v48, %v81_v47  ;;  %v2223_v54 = vld [vmem:[%s3333_s4 + $0x30] sm:$0xff]  }
  0x3f   :  { %2097 = vmatprep.subr.bf16.mxu1 %v2220_v57 }
  0x42   :  { %2098 = vmatpush3.bf16.msra.mxu1 %v2220_v57  ;;  %v821_v57 = vld [vmem:[%s3330_s1] sm:$0xff] }
  0x43   :  { %2099 = vmatprep.subr.bf16.mxu1 %v2221_v62  ;;  %885 = vrot.lane.b32.xlu0 %v821_v57, %s2432_s25 }
  0x44   :  { %333 = vmatmul.mubr.bf16.gmra.mrb[8].mxu0 %v121_v58  ;;  %397 = vmatmul.mubr.bf16.gmra.mrb[8].mxu1 %v137_v60  ;;  %v824_v58 = vld [vmem:[%s3330_s1 + $0x18] sm:$0xff]  ;;  %v825_v60 = vld [vmem:[%s3330_s1 + $0x20] sm:$0xff] }
  0x45   :  { %340 = vmatprep.mubr.bf16.mxu0 %v124_v59  ;;  %404 = vmatprep.mubr.bf16.mxu1 %v140_v61  ;;  %v822_v59 = vld [vmem:[%s3330_s1 + $0x8] sm:$0xff] }
  0x46   :  { %2100 = vmatpush3.bf16.msra.mxu1 %v2221_v62  ;;  %891 = vrot.lane.b32.xlu1 %v824_v58, %s2432_s25  ;;  %v826_v61 = vld [vmem:[%s3330_s1 + $0x28] sm:$0xff]  ;;  %v827_v62 = vld [vmem:[%s3330_s1 + $0x30] sm:$0xff] }
  0x47   :  { %2101 = vmatprep.subr.bf16.mxu1 %v2222_v53  ;;  %887 = vrot.lane.b32.xlu0 %v822_v59, %s2432_s25 }
  0x4a   :  { %2102 = vmatpush3.bf16.msra.mxu1 %v2222_v53  ;;  %895 = vrot.lane.b32.xlu1 %v826_v61, %s2432_s25 }
  0x4b   :  { %2103 = vmatprep.subr.bf16.mxu1 %v2223_v54  ;;  %893 = vrot.lane.b32.xlu0 %v825_v60, %s2432_s25 }
  0x4c   :  { %341 = vmatmul.mubr.bf16.gmra.mrb[12].mxu0 %v123_v7  ;;  %405 = vmatmul.mubr.bf16.gmra.mrb[12].mxu1 %v139_v9  ;;  %v836_v7 = vld [vmem:[%s3330_s1 + $0x78] sm:$0xff]  ;;  %v2649_v9 = vld [vmem:[%s3332_s3] ss:$0 sm:$0xff] }
  0x4d   :  { %348 = vmatprep.mubr.bf16.mxu0 %v126_v8  ;;  %412 = vmatprep.mubr.bf16.mxu1 %v142_v10 }
  0x4e   :  { %2104 = vmatpush3.bf16.msra.mxu1 %v2223_v54  ;;  %899 = vrot.lane.b32.xlu1 %v828_v63, %s2432_s25 }
  0x4f   :  { %2105 = vmatprep.subr.bf16.mxu1 %v2224_v55  ;;  %897 = vrot.lane.b32.xlu0 %v827_v62, %s2432_s25 }
  0x52   :  { %2106 = vmatpush3.bf16.msra.mxu1 %v2224_v55  ;;  %903 = vrot.lane.b32.xlu1 %v830_v1, %s2432_s25 }
  0x53   :  { %901 = vrot.lane.b32.xlu0 %v829_v0, %s2432_s25 }
  0x54   :  { %349 = vmatmul.mubr.bf16.gmra.mrb[16].mxu0 %v125_v19  ;;  %413 = vmatmul.mubr.bf16.gmra.mrb[16].mxu1 %v141_v21 }
  0x55   :  { %356 = vmatprep.mubr.bf16.mxu0 %v128_v20  ;;  %420 = vmatprep.mubr.bf16.mxu1 %v144_v22 }
  0x56   :  { %907 = vrot.lane.b32.xlu1 %v832_v3, %s2432_s25 }
  0x57   :  { %905 = vrot.lane.b32.xlu0 %v831_v2, %s2432_s25 }
  0x5a   :  { %911 = vrot.lane.b32.xlu1 %v834_v5, %s2432_s25 }
  0x5b   :  { %909 = vrot.lane.b32.xlu0 %v833_v4, %s2432_s25 }
  0x5c   :  { %357 = vmatmul.mubr.bf16.gmra.mrb[20].mxu0 %v127_v31  ;;  %421 = vmatmul.mubr.bf16.gmra.mrb[20].mxu1 %v143_v33 }
  0x5d   :  { %364 = vmatprep.mubr.bf16.mxu0 %v130_v32  ;;  %428 = vmatprep.mubr.bf16.mxu1 %v146_v34 }
  0x5e   :  { %915 = vrot.lane.b32.xlu1 %v836_v7, %s2432_s25 }
  0x5f   :  { %913 = vrot.lane.b32.xlu0 %v835_v6, %s2432_s25 }
  0x64   :  { %365 = vmatmul.mubr.bf16.gmra.mrb[24].mxu0 %v129_v43  ;;  %429 = vmatmul.mubr.bf16.gmra.mrb[24].mxu1 %v145_v45 }
  0x65   :  { %372 = vmatprep.mubr.bf16.mxu0 %v132_v44  ;;  %436 = vmatprep.mubr.bf16.mxu1 %v148_v46 }
  0x6c   :  { %373 = vmatmul.mubr.bf16.gmra.mrb[28].mxu0 %v131_v51  ;;  %437 = vmatmul.mubr.bf16.gmra.mrb[28].mxu1 %v147_v52 }
 0x107   :  { %v1951_v8 = vpop.f32.mrb[0].mxu0  ;;  %v1999_v11 = vpop.f32.mrb[0].mxu1 }
 0x108   :  { %v1952_v10 = vpop.f32.mrb[1].mxu0  ;;  %v2000_v14 = vpop.f32.mrb[1].mxu1 }
 0x109   :  { %v1953_v12 = vadd.f32 %v1952_v10, %v1951_v8  ;;  %v1954_v13 = vpop.f32.mrb[2].mxu0  ;;  %v2001_v16 = vadd.f32 %v2000_v14, %v1999_v11  ;;  %v2002_v17 = vpop.f32.mrb[2].mxu1 }
 0x10a   :  { %v1955_v15 = vpop.f32.mrb[3].mxu0  ;;  %v2003_v20 = vpop.f32.mrb[3].mxu1 }
 0x10b   :  { %v319_v18 = vadd.f32 %v1953_v12, %v2649_v9  ;;  %v1956_v19 = vadd.f32 %v1955_v15, %v1954_v13  ;;  %v383_v21 = vadd.f32 %v2001_v16, %v2649_v9  ;;  %v2004_v22 = vadd.f32 %v2003_v20, %v2002_v17 }
 0x10d   :  { %2253 = vtanh.f32 %v319_v18  ;;  %v322_v23 = vadd.f32 %v1956_v19, %v2649_v9  ;;  %v386_v24 = vadd.f32 %v2004_v22, %v2649_v9 }
 0x10e   :  { %2255 = vtanh.f32 %v383_v21 }
 0x10f   :  { %2257 = vtanh.f32 %v322_v23  ;;  %v1957_v25 = vpop.f32.mrb[4].mxu0  ;;  %v2005_v27 = vpop.f32.mrb[4].mxu1 }
 0x110   :  { %v1958_v26 = vpop.f32.mrb[5].mxu0  ;;  %2259 = vtanh.f32 %v386_v24  ;;  %v2006_v30 = vpop.f32.mrb[5].mxu1 }
 0x111   :  { %v1959_v28 = vadd.f32 %v1958_v26, %v1957_v25  ;;  %v1960_v29 = vpop.f32.mrb[6].mxu0  ;;  %v2007_v32 = vadd.f32 %v2006_v30, %v2005_v27  ;;  %v2008_v33 = vpop.f32.mrb[6].mxu1 }
 0x112   :  { %v1961_v31 = vpop.f32.mrb[7].mxu0  ;;  %v2009_v36 = vpop.f32.mrb[7].mxu1 }
 0x113   :  { %v327_v34 = vadd.f32 %v1959_v28, %v2649_v9  ;;  %v1962_v35 = vadd.f32 %v1961_v31, %v1960_v29  ;;  %v391_v37 = vadd.f32 %v2007_v32, %v2649_v9  ;;  %v2010_v38 = vadd.f32 %v2009_v36, %v2008_v33 }
 0x115   :  { %2261 = vtanh.f32 %v327_v34  ;;  %v330_v39 = vadd.f32 %v1962_v35, %v2649_v9  ;;  %v394_v40 = vadd.f32 %v2010_v38, %v2649_v9 }
 0x116   :  { %2263 = vtanh.f32 %v391_v37 }
 0x117   :  { %v2254_v41 = vpop.eup %2253  ;;  %2265 = vtanh.f32 %v330_v39  ;;  %v1963_v42 = vpop.f32.mrb[8].mxu0 }
 0x118   :  { %v2659_v43 = vpop.eup %2255  ;;  %v1964_v44 = vpop.f32.mrb[9].mxu0  ;;  %2267 = vtanh.f32 %v394_v40 }
 0x119   :  { %v2011_v45 = vpop.f32.mrb[8].mxu1  ;;  %v2258_v46 = vpop.eup %2257  ;;  %v1965_v47 = vadd.f32 %v1964_v44, %v1963_v42 }
 0x11a   :  { %v1966_v48 = vpop.f32.mrb[10].mxu0  ;;  %v2012_v49 = vpop.f32.mrb[9].mxu1  ;;  %v477_v52 = vpack.c.bf16 %v2258_v46, %v2254_v41 }
 0x11b   :  { %v2661_v50 = vpop.eup %2259  ;;  %v1967_v51 = vpop.f32.mrb[11].mxu0  ;;  %v2013_v53 = vadd.f32 %v2012_v49, %v2011_v45  ;;  %v335_v55 = vadd.f32 %v1965_v47, %v2649_v9 }
 0x11c   :  { %v2014_v54 = vpop.f32.mrb[10].mxu1  ;;  %v1968_v56 = vadd.f32 %v1967_v51, %v1966_v48  ;;  %v485_v58 = vpack.c.bf16 %v2661_v50, %v2659_v43  ;;  %2107 = vmatprep.mubr.bf16.mxu1 %v477_v52  ;;  %v2226_v43 = vld [vmem:[%s3335_s6 + $0x8] sm:$0xff]   ;;  %v2734_v50 = vld [vmem:[%s3334_s5] ss:$0 sm:$0xff] }
 0x11d   :  { %v2015_v57 = vpop.f32.mrb[11].mxu1  ;;  %v399_v59 = vadd.f32 %v2013_v53, %v2649_v9  ;;  %2269 = vtanh.f32 %v335_v55 }
 0x11e   :  { %v2016_v60 = vadd.f32 %v2015_v57, %v2014_v54  ;;  %v338_v61 = vadd.f32 %v1968_v56, %v2649_v9 }
 0x11f   :  { %2271 = vtanh.f32 %v399_v59  ;;  %v2262_v63 = vpop.eup %2261  ;;  %v1969_v0 = vpop.f32.mrb[12].mxu0 }
 0x120   :  { %v402_v62 = vadd.f32 %v2016_v60, %v2649_v9  ;;  %2273 = vtanh.f32 %v338_v61  ;;  %v2669_v1 = vpop.eup %2263  ;;  %v1970_v2 = vpop.f32.mrb[13].mxu0 }
 0x121   :  { %v2017_v3 = vpop.f32.mrb[12].mxu1  ;;  %v2266_v4 = vpop.eup %2265  ;;  %v1971_v5 = vadd.f32 %v1970_v2, %v1969_v0 }
 0x122   :  { %2275 = vtanh.f32 %v402_v62  ;;  %v1972_v6 = vpop.f32.mrb[14].mxu0  ;;  %v2018_v7 = vpop.f32.mrb[13].mxu1  ;;  %v478_v11 = vpack.c.bf16 %v2266_v4, %v2262_v63 }
 0x123   :  { %v2671_v8 = vpop.eup %2267  ;;  %v1973_v10 = vpop.f32.mrb[15].mxu0  ;;  %v2019_v12 = vadd.f32 %v2018_v7, %v2017_v3  ;;  %v343_v14 = vadd.f32 %v1971_v5, %v2649_v9 }
 0x124   :  { %v2020_v13 = vpop.f32.mrb[14].mxu1  ;;  %v1974_v15 = vadd.f32 %v1973_v10, %v1972_v6  ;;  %v486_v17 = vpack.c.bf16 %v2671_v8, %v2669_v1  ;;  %2108 = vmatmul.mubr.bf16.vlgmr.msra.gmra.mrb[32].mxu1 %v478_v11 }
 0x125   :  { %v2021_v16 = vpop.f32.mrb[15].mxu1  ;;  %v407_v18 = vadd.f32 %v2019_v12, %v2649_v9  ;;  %2277 = vtanh.f32 %v343_v14 }
 0x126   :  { %v2022_v19 = vadd.f32 %v2021_v16, %v2020_v13  ;;  %v346_v20 = vadd.f32 %v1974_v15, %v2649_v9 }
 0x127   :  { %2279 = vtanh.f32 %v407_v18  ;;  %v2270_v22 = vpop.eup %2269  ;;  %v1975_v23 = vpop.f32.mrb[16].mxu0 }
 0x128   :  { %v410_v21 = vadd.f32 %v2022_v19, %v2649_v9  ;;  %2281 = vtanh.f32 %v346_v20  ;;  %v1976_v25 = vpop.f32.mrb[17].mxu0  ;;  %v2023_v26 = vpop.f32.mrb[16].mxu1 }
 0x129   :  { %v2679_v24 = vpop.eup %2271  ;;  %v1977_v28 = vadd.f32 %v1976_v25, %v1975_v23  ;;  %v1978_v29 = vpop.f32.mrb[18].mxu0 }
 0x12a   :  { %2283 = vtanh.f32 %v410_v21  ;;  %v2274_v27 = vpop.eup %2273  ;;  %v2024_v30 = vpop.f32.mrb[17].mxu1 }
 0x12b   :  { %v1979_v32 = vpop.f32.mrb[19].mxu0  ;;  %v479_v33 = vpack.c.bf16 %v2274_v27, %v2270_v22  ;;  %v2025_v34 = vadd.f32 %v2024_v30, %v2023_v26  ;;  %v2026_v35 = vpop.f32.mrb[18].mxu1  ;;  %v351_v36 = vadd.f32 %v1977_v28, %v2649_v9 }
 0x12c   :  { %v2681_v31 = vpop.eup %2275  ;;  %v1980_v37 = vadd.f32 %v1979_v32, %v1978_v29  ;;  %v2027_v38 = vpop.f32.mrb[19].mxu1 }
 0x12d   :  { %v487_v39 = vpack.c.bf16 %v2681_v31, %v2679_v24  ;;  %2111 = vmatprep.mubr.bf16.mxu1 %v479_v33  ;;  %v415_v40 = vadd.f32 %v2025_v34, %v2649_v9  ;;  %v2028_v41 = vadd.f32 %v2027_v38, %v2026_v35  ;;  %2285 = vtanh.f32 %v351_v36 }
 0x12e   :  { %v354_v42 = vadd.f32 %v1980_v37, %v2649_v9 }
 0x12f   :  { %2287 = vtanh.f32 %v415_v40  ;;  %v418_v44 = vadd.f32 %v2028_v41, %v2649_v9  ;;  %v2278_v45 = vpop.eup %2277  ;;  %v1981_v46 = vpop.f32.mrb[20].mxu0 }
 0x130   :  { %2289 = vtanh.f32 %v354_v42  ;;  %v1982_v48 = vpop.f32.mrb[21].mxu0  ;;  %v2029_v49 = vpop.f32.mrb[20].mxu1 }
 0x131   :  { %v2689_v47 = vpop.eup %2279  ;;  %2291 = vtanh.f32 %v418_v44  ;;  %v1983_v52 = vadd.f32 %v1982_v48, %v1981_v46  ;;  %v1984_v53 = vpop.f32.mrb[22].mxu0 }
 0x132   :  { %v2282_v51 = vpop.eup %2281  ;;  %v2030_v54 = vpop.f32.mrb[21].mxu1 }
 0x133   :  { %v1985_v56 = vpop.f32.mrb[23].mxu0  ;;  %v480_v57 = vpack.c.bf16 %v2282_v51, %v2278_v45  ;;  %v2031_v59 = vadd.f32 %v2030_v54, %v2029_v49  ;;  %v2032_v60 = vpop.f32.mrb[22].mxu1  ;;  %v359_v61 = vadd.f32 %v1983_v52, %v2649_v9 }
 0x134   :  { %v2691_v55 = vpop.eup %2283  ;;  %v1986_v62 = vadd.f32 %v1985_v56, %v1984_v53  ;;  %v2033_v63 = vpop.f32.mrb[23].mxu1 }
 0x135   :  { %v488_v0 = vpack.c.bf16 %v2691_v55, %v2689_v47  ;;  %2112 = vmatmul.mubr.bf16.gmra.mrb[36].mxu1 %v480_v57  ;;  %v423_v2 = vadd.f32 %v2031_v59, %v2649_v9  ;;  %v2034_v3 = vadd.f32 %v2033_v63, %v2032_v60  ;;  %2293 = vtanh.f32 %v359_v61 }
 0x136   :  { %v362_v4 = vadd.f32 %v1986_v62, %v2649_v9 }
 0x137   :  { %2295 = vtanh.f32 %v423_v2  ;;  %v426_v5 = vadd.f32 %v2034_v3, %v2649_v9  ;;  %v2286_v6 = vpop.eup %2285  ;;  %v1987_v7 = vpop.f32.mrb[24].mxu0 }
 0x138   :  { %2297 = vtanh.f32 %v362_v4  ;;  %v1988_v11 = vpop.f32.mrb[25].mxu0  ;;  %v2035_v12 = vpop.f32.mrb[24].mxu1 }
 0x139   :  { %v2699_v10 = vpop.eup %2287  ;;  %2299 = vtanh.f32 %v426_v5  ;;  %v1989_v14 = vadd.f32 %v1988_v11, %v1987_v7  ;;  %v1990_v15 = vpop.f32.mrb[26].mxu0 }
 0x13a   :  { %v2290_v13 = vpop.eup %2289  ;;  %v2036_v16 = vpop.f32.mrb[25].mxu1 }
 0x13b   :  { %v2701_v18 = vpop.eup %2291  ;;  %v1991_v19 = vpop.f32.mrb[27].mxu0  ;;  %v481_v20 = vpack.c.bf16 %v2290_v13, %v2286_v6  ;;  %v2037_v21 = vadd.f32 %v2036_v16, %v2035_v12  ;;  %v367_v23 = vadd.f32 %v1989_v14, %v2649_v9 }
 0x13c   :  { %v2038_v22 = vpop.f32.mrb[26].mxu1  ;;  %v1992_v25 = vadd.f32 %v1991_v19, %v1990_v15  ;;  %v489_v27 = vpack.c.bf16 %v2701_v18, %v2699_v10 }
 0x13d   :  { %v2039_v26 = vpop.f32.mrb[27].mxu1  ;;  %2115 = vmatprep.mubr.bf16.mxu1 %v481_v20  ;;  %v431_v28 = vadd.f32 %v2037_v21, %v2649_v9  ;;  %2301 = vtanh.f32 %v367_v23  ;;  %v2227_v20 = vld [vmem:[%s3335_s6 + $0x10] sm:$0xff]   ;;  %v890_v21 = vpop.permute.xlu1 %889 }
 0x13e   :  { %v2040_v29 = vadd.f32 %v2039_v26, %v2038_v22  ;;  %v370_v30 = vadd.f32 %v1992_v25, %v2649_v9  ;;  %v2228_v22 = vld [vmem:[%s3335_s6 + $0x18] sm:$0xff]   ;;  %v886_v23 = vpop.permute.xlu0 %885 }
 0x13f   :  { %2303 = vtanh.f32 %v431_v28  ;;  %v2294_v33 = vpop.eup %2293  ;;  %v1993_v34 = vpop.f32.mrb[28].mxu0 }
 0x140   :  { %v434_v32 = vadd.f32 %v2040_v29, %v2649_v9  ;;  %2305 = vtanh.f32 %v370_v30  ;;  %v1994_v36 = vpop.f32.mrb[29].mxu0  ;;  %v2041_v37 = vpop.f32.mrb[28].mxu1 }
 0x141   :  { %v2296_v35 = vpop.eup %2295  ;;  %v1995_v40 = vadd.f32 %v1994_v36, %v1993_v34  ;;  %v1996_v41 = vpop.f32.mrb[30].mxu0 }
 0x142   :  { %2307 = vtanh.f32 %v434_v32  ;;  %v2298_v38 = vpop.eup %2297  ;;  %v2042_v42 = vpop.f32.mrb[29].mxu1 }
 0x143   :  { %v2300_v44 = vpop.eup %2299  ;;  %v1997_v45 = vpop.f32.mrb[31].mxu0  ;;  %v482_v46 = vpack.c.bf16 %v2298_v38, %v2294_v33  ;;  %v2043_v48 = vadd.f32 %v2042_v42, %v2041_v37  ;;  %v375_v51 = vadd.f32 %v1995_v40, %v2649_v9 }
 0x144   :  { %v2044_v49 = vpop.f32.mrb[30].mxu1  ;;  %v1998_v52 = vadd.f32 %v1997_v45, %v1996_v41  ;;  %v490_v54 = vpack.c.bf16 %v2300_v44, %v2296_v35  ;;  %v892_v29 = vpop.permute.xlu1 %891 }
 0x145   :  { %v2045_v53 = vpop.f32.mrb[31].mxu1  ;;  %2116 = vmatmul.mubr.bf16.gmra.mrb[40].mxu1 %v482_v46  ;;  %v439_v56 = vadd.f32 %v2043_v48, %v2649_v9  ;;  %2309 = vtanh.f32 %v375_v51  ;;  %v888_v48 = vpop.permute.xlu0 %887 }
 0x146   :  { %v2046_v57 = vadd.f32 %v2045_v53, %v2044_v49  ;;  %v378_v59 = vadd.f32 %v1998_v52, %v2649_v9 }
 0x147   :  { %2311 = vtanh.f32 %v439_v56  ;;  %v2302_v61 = vpop.eup %2301 }
 0x148   :  { %v442_v60 = vadd.f32 %v2046_v57, %v2649_v9  ;;  %2313 = vtanh.f32 %v378_v59  ;;  %v2225_v9 = vld [vmem:[%s3335_s6] sm:$0xff]  }
 0x149   :  { %v2304_v62 = vpop.eup %2303  ;;  %2139 = vmatprep.subr.bf16.mxu1 %v2225_v9  ;;  %v837_v57 = vld [vmem:[%s3330_s1 + $0x80] sm:$0xff]  ;;  %v894_v59 = vpop.permute.xlu0 %893 }
 0x14a   :  { %2315 = vtanh.f32 %v442_v60  ;;  %v2306_v63 = vpop.eup %2305  ;;  %2140 = vmatpush3.bf16.msra.mxu1 %v2225_v9  ;;  %v838_v60 = vld [vmem:[%s3330_s1 + $0x88] sm:$0xff] }
 0x14b   :  { %v483_v3 = vpack.c.bf16 %v2306_v63, %v2302_v61  ;;  %2141 = vmatprep.subr.bf16.mxu1 %v2226_v43  ;;  %v896_v61 = vpop.permute.xlu1 %895 }
 0x14c   :  { %v2308_v2 = vpop.eup %2307 }
 0x14d   :  { %v491_v4 = vpack.c.bf16 %v2308_v2, %v2304_v62  ;;  %2119 = vmatprep.mubr.bf16.mxu1 %v483_v3  ;;  %v839_v62 = vld [vmem:[%s3330_s1 + $0x90] sm:$0xff]  ;;  %v898_v63 = vpop.permute.xlu0 %897  ;;  %v840_v2 = vld [vmem:[%s3330_s1 + $0x98] sm:$0xff] }
 0x14e   :  { %2142 = vmatpush3.bf16.msra.mxu1 %v2226_v43 }
 0x14f   :  { %v2310_v5 = vpop.eup %2309  ;;  %2143 = vmatprep.subr.bf16.mxu1 %v2227_v20 }
 0x151   :  { %v2312_v6 = vpop.eup %2311 }
 0x152   :  { %v2314_v7 = vpop.eup %2313  ;;  %2144 = vmatpush3.bf16.msra.mxu1 %v2227_v20 }
 0x153   :  { %v484_v11 = vpack.c.bf16 %v2314_v7, %v2310_v5  ;;  %2145 = vmatprep.subr.bf16.mxu1 %v2228_v22  ;;  %v900_v7 = vpop.permute.xlu1 %899 }
 0x154   :  { %v2316_v10 = vpop.eup %2315 }
 0x155   :  { %v492_v12 = vpack.c.bf16 %v2316_v10, %v2312_v6  ;;  %2120 = vmatmul.mubr.bf16.gmra.mrb[44].mxu1 %v484_v11 }
 0x156   :  { %2123 = vmatprep.mubr.bf16.mxu1 %v485_v58  ;;  %2146 = vmatpush3.bf16.msra.mxu1 %v2228_v22 }
 0x15d   :  { %2124 = vmatmul.mubr.bf16.gmra.mrb[48].mxu1 %v486_v17 }
 0x15e   :  { %2127 = vmatprep.mubr.bf16.mxu1 %v487_v39 }
 0x165   :  { %2128 = vmatmul.mubr.bf16.gmra.mrb[52].mxu1 %v488_v0 }
 0x166   :  { %2131 = vmatprep.mubr.bf16.mxu1 %v489_v27 }
 0x16d   :  { %2132 = vmatmul.mubr.bf16.gmra.mrb[56].mxu1 %v490_v54 }
 0x16e   :  { %2135 = vmatprep.mubr.bf16.mxu1 %v491_v4 }
 0x175   :  { %2136 = vmatmul.mubr.bf16.gmra.mrb[60].mxu1 %v492_v12 }
 0x1f7   :  { %v2109_v58 = vpop.f32.mrb[32].mxu1 }
 0x1f8   :  { %v2737_v1 = vadd.f32 %v2109_v58, %v2734_v50  ;;  %v598_v8 = vpop.f32.mrb[33].mxu1 }
 0x1f9   :  { %v2740_v17 = vadd.f32 %v2734_v50, %v598_v8  ;;  %v2110_v24 = vpop.f32.mrb[34].mxu1 }
 0x1fa   :  { %v727_v31 = vmul.f32 0.5, %v2737_v1  ;;  %1821 = vst [vmem:[%s3340_s11 + $0x10] sm:$0xff] %v2737_v1  ;;  %v2748_v39 = vadd.f32 %v2110_v24, %v2734_v50  ;;  %v601_v47 = vpop.f32.mrb[35].mxu1 }
 0x1fb   :  { %v725_v55 = vmul.f32 0.5, %v2740_v17  ;;  %1819 = vst [vmem:[%s3340_s11] sm:$0xff] %v2740_v17  ;;  %v2756_v0 = vadd.f32 %v2734_v50, %v601_v47 }
 0x1fc   :  { %v761_v13 = vmul.f32 1.442695, %v727_v31  ;;  %v728_v14 = vmul.f32 0.5, %v2748_v39  ;;  %1822 = vst [vmem:[%s3340_s11 + $0x18] sm:$0xff] %v2748_v39 }
 0x1fd   :  { %v757_v15 = vmul.f32 1.442695, %v725_v55  ;;  %v726_v16 = vmul.f32 0.5, %v2756_v0  ;;  %1820 = vst [vmem:[%s3340_s11 + $0x8] sm:$0xff] %v2756_v0 }
 0x1fe   :  { %2317 = vpow2.f32 %v761_v13  ;;  %v763_v18 = vmul.f32 1.442695, %v728_v14 }
 0x1ff   :  { %2319 = vpow2.f32 %v757_v15  ;;  %v759_v19 = vmul.f32 1.442695, %v726_v16 }
 0x200   :  { %2321 = vpow2.f32 %v763_v18 }
 0x201   :  { %2323 = vpow2.f32 %v759_v19 }
 0x208   :  { %v2113_v25 = vpop.f32.mrb[36].mxu1  ;;  %v2318_v26 = vpop.eup %2317 }
 0x209   :  { %v2775_v27 = vadd.f32 %v2113_v25, %v2734_v50  ;;  %v614_v28 = vpop.f32.mrb[37].mxu1  ;;  %v2320_v30 = vpop.eup %2319  ;;  %v983_v32 = vmul.f32 %v2318_v26, %v890_v21  ;;  %v842_v26 = vld [vmem:[%s3330_s1 + $0xa8] sm:$0xff] }
 0x20a   :  { %v2778_v33 = vadd.f32 %v2734_v50, %v614_v28  ;;  %v2114_v34 = vpop.f32.mrb[38].mxu1  ;;  %v2322_v35 = vpop.eup %2321  ;;  %v981_v49 = vmul.f32 %v2320_v30, %v886_v23  ;;  %v841_v23 = vld [vmem:[%s3330_s1 + $0xa0] sm:$0xff] }
 0x20b   :  { %v731_v36 = vmul.f32 0.5, %v2775_v27  ;;  %1825 = vst [vmem:[%s3340_s11 + $0x30] sm:$0xff] %v2775_v27  ;;  %v2786_v37 = vadd.f32 %v2114_v34, %v2734_v50  ;;  %v617_v38 = vpop.f32.mrb[39].mxu1  ;;  %v984_v41 = vmul.f32 %v2322_v35, %v892_v29  ;;  %1049 = vrot.lane.b32.xlu0 %v983_v32, %s2432_s25  ;;  %v2324_v44 = vpop.eup %2323  ;;  %v843_v29 = vld [vmem:[%s3330_s1 + $0xb0] sm:$0xff]  ;;  %v844_v32 = vld [vmem:[%s3330_s1 + $0xb8] sm:$0xff] }
 0x20c   :  { %v729_v40 = vmul.f32 0.5, %v2778_v33  ;;  %1823 = vst [vmem:[%s3340_s11 + $0x20] sm:$0xff] %v2778_v33  ;;  %v2794_v42 = vadd.f32 %v2734_v50, %v617_v38  ;;  %v982_v56 = vmul.f32 %v2324_v44, %v888_v48  ;;  %v902_v25 = vpop.permute.xlu0 %901  ;;  %v904_v28 = vpop.permute.xlu1 %903 }
 0x20d   :  { %v769_v45 = vmul.f32 1.442695, %v731_v36  ;;  %v732_v46 = vmul.f32 0.5, %v2786_v37  ;;  %1826 = vst [vmem:[%s3340_s11 + $0x38] sm:$0xff] %v2786_v37  ;;  %1051 = vrot.lane.b32.xlu1 %v984_v41, %s2432_s25 }
 0x20e   :  { %v765_v51 = vmul.f32 1.442695, %v729_v40  ;;  %v730_v52 = vmul.f32 0.5, %v2794_v42  ;;  %1824 = vst [vmem:[%s3340_s11 + $0x28] sm:$0xff] %v2794_v42 }
 0x20f   :  { %2325 = vpow2.f32 %v769_v45  ;;  %v771_v53 = vmul.f32 1.442695, %v732_v46  ;;  %1045 = vrot.lane.b32.xlu0 %v981_v49, %s2432_s25 }
 0x210   :  { %2327 = vpow2.f32 %v765_v51  ;;  %v767_v54 = vmul.f32 1.442695, %v730_v52  ;;  %v906_v30 = vpop.permute.xlu0 %905  ;;  %v908_v40 = vpop.permute.xlu1 %907 }
 0x211   :  { %2329 = vpow2.f32 %v771_v53  ;;  %1047 = vrot.lane.b32.xlu1 %v982_v56, %s2432_s25 }
 0x212   :  { %2331 = vpow2.f32 %v767_v54 }
 0x213   :  { %917 = vrot.lane.b32.xlu0 %v837_v57, %s2432_s25 }
 0x215   :  { %919 = vrot.lane.b32.xlu1 %v838_v60, %s2432_s25 }
 0x217   :  { %921 = vrot.lane.b32.xlu0 %v839_v62, %s2432_s25 }
 0x218   :  { %v2117_v3 = vpop.f32.mrb[40].mxu1 }
 0x219   :  { %v2326_v4 = vpop.eup %2325  ;;  %v2826_v5 = vadd.f32 %v2117_v3, %v2734_v50  ;;  %v630_v6 = vpop.f32.mrb[41].mxu1  ;;  %923 = vrot.lane.b32.xlu1 %v840_v2, %s2432_s25 }
 0x21a   :  { %v2328_v10 = vpop.eup %2327  ;;  %v987_v11 = vmul.f32 %v2326_v4, %v898_v63  ;;  %v2829_v12 = vadd.f32 %v2734_v50, %v630_v6  ;;  %v2118_v9 = vpop.f32.mrb[42].mxu1 }
 0x21b   :  { %v2330_v43 = vpop.eup %2329  ;;  %v735_v58 = vmul.f32 0.5, %v2826_v5  ;;  %1829 = vst [vmem:[%s3340_s11 + $0x50] sm:$0xff] %v2826_v5  ;;  %v2838_v8 = vadd.f32 %v2118_v9, %v2734_v50  ;;  %v633_v24 = vpop.f32.mrb[43].mxu1  ;;  %v985_v16 = vmul.f32 %v2328_v10, %v894_v59 }
 0x21c   :  { %v733_v31 = vmul.f32 0.5, %v2829_v12  ;;  %1827 = vst [vmem:[%s3340_s11 + $0x40] sm:$0xff] %v2829_v12  ;;  %v988_v47 = vmul.f32 %v2330_v43, %v900_v7  ;;  %v2846_v55 = vadd.f32 %v2734_v50, %v633_v24  ;;  %1057 = vrot.lane.b32.xlu0 %v987_v11, %s2432_s25  ;;  %v2332_v13 = vpop.eup %2331  ;;  %v845_v7 = vld [vmem:[%s3330_s1 + $0xc0] sm:$0xff]  ;;  %v910_v10 = vpop.permute.xlu0 %909  ;;  %v846_v24 = vld [vmem:[%s3330_s1 + $0xc8] sm:$0xff] }
 0x21d   :  { %v777_v14 = vmul.f32 1.442695, %v735_v58  ;;  %v736_v15 = vmul.f32 0.5, %v2838_v8  ;;  %1830 = vst [vmem:[%s3340_s11 + $0x58] sm:$0xff] %v2838_v8  ;;  %v986_v21 = vmul.f32 %v2332_v13, %v896_v61 }
 0x21e   :  { %v773_v18 = vmul.f32 1.442695, %v733_v31  ;;  %v734_v19 = vmul.f32 0.5, %v2846_v55  ;;  %1828 = vst [vmem:[%s3340_s11 + $0x48] sm:$0xff] %v2846_v55  ;;  %1059 = vrot.lane.b32.xlu1 %v988_v47, %s2432_s25  ;;  %v912_v31 = vpop.permute.xlu1 %911 }
 0x21f   :  { %2333 = vpow2.f32 %v777_v14  ;;  %v779_v20 = vmul.f32 1.442695, %v736_v15  ;;  %v847_v15 = vld [vmem:[%s3330_s1 + $0xd0] sm:$0xff] }
 0x220   :  { %2335 = vpow2.f32 %v773_v18  ;;  %v775_v22 = vmul.f32 1.442695, %v734_v19  ;;  %1053 = vrot.lane.b32.xlu0 %v985_v16, %s2432_s25  ;;  %v914_v16 = vpop.permute.xlu0 %913  ;;  %v848_v18 = vld [vmem:[%s3330_s1 + $0xd8] sm:$0xff] }
 0x221   :  { %2337 = vpow2.f32 %v779_v20 }
 0x222   :  { %1055 = vrot.lane.b32.xlu1 %v986_v21, %s2432_s25  ;;  %2339 = vpow2.f32 %v775_v22  ;;  %v916_v21 = vpop.permute.xlu1 %915 }
 0x224   :  { %925 = vrot.lane.b32.xlu0 %v841_v23, %s2432_s25 }
 0x226   :  { %927 = vrot.lane.b32.xlu1 %v842_v26, %s2432_s25 }
 0x228   :  { %v2121_v34 = vpop.f32.mrb[44].mxu1  ;;  %929 = vrot.lane.b32.xlu0 %v843_v29, %s2432_s25 }
 0x229   :  { %v2334_v35 = vpop.eup %2333  ;;  %v2878_v36 = vadd.f32 %v2121_v34, %v2734_v50  ;;  %v646_v38 = vpop.f32.mrb[45].mxu1 }
 0x22a   :  { %v2336_v41 = vpop.eup %2335  ;;  %v991_v44 = vmul.f32 %v2334_v35, %v906_v30  ;;  %v2881_v45 = vadd.f32 %v2734_v50, %v646_v38  ;;  %v2122_v46 = vpop.f32.mrb[46].mxu1  ;;  %931 = vrot.lane.b32.xlu1 %v844_v32, %s2432_s25 }
 0x22b   :  { %v2338_v48 = vpop.eup %2337  ;;  %v739_v49 = vmul.f32 0.5, %v2878_v36  ;;  %1833 = vst [vmem:[%s3340_s11 + $0x70] sm:$0xff] %v2878_v36  ;;  %v2890_v51 = vadd.f32 %v2122_v46, %v2734_v50  ;;  %v649_v52 = vpop.f32.mrb[47].mxu1  ;;  %v989_v61 = vmul.f32 %v2336_v41, %v902_v25 }
 0x22c   :  { %v737_v53 = vmul.f32 0.5, %v2881_v45  ;;  %1831 = vst [vmem:[%s3340_s11 + $0x60] sm:$0xff] %v2881_v45  ;;  %v992_v54 = vmul.f32 %v2338_v48, %v908_v40  ;;  %v2898_v56 = vadd.f32 %v2734_v50, %v649_v52  ;;  %1065 = vrot.lane.b32.xlu0 %v991_v44, %s2432_s25  ;;  %v2340_v57 = vpop.eup %2339  ;;  %v849_v48 = vld [vmem:[%s3330_s1 + $0xe0] sm:$0xff] }
 0x22d   :  { %v785_v59 = vmul.f32 1.442695, %v739_v49  ;;  %v740_v60 = vmul.f32 0.5, %v2890_v51  ;;  %1834 = vst [vmem:[%s3340_s11 + $0x78] sm:$0xff] %v2890_v51  ;;  %v990_v3 = vmul.f32 %v2340_v57, %v904_v28  ;;  %v850_v57 = vld [vmem:[%s3330_s1 + $0xe8] sm:$0xff] }
 0x22e   :  { %v781_v62 = vmul.f32 1.442695, %v737_v53  ;;  %v738_v63 = vmul.f32 0.5, %v2898_v56  ;;  %1832 = vst [vmem:[%s3340_s11 + $0x68] sm:$0xff] %v2898_v56  ;;  %1067 = vrot.lane.b32.xlu1 %v992_v54, %s2432_s25 }
 0x22f   :  { %2341 = vpow2.f32 %v785_v59  ;;  %v787_v2 = vmul.f32 1.442695, %v740_v60 }
 0x230   :  { %2343 = vpow2.f32 %v781_v62  ;;  %v783_v4 = vmul.f32 1.442695, %v738_v63  ;;  %1061 = vrot.lane.b32.xlu0 %v989_v61, %s2432_s25  ;;  %v2125_v6 = vpop.f32.mrb[48].mxu1  ;;  %v851_v62 = vld [vmem:[%s3330_s1 + $0xf0] sm:$0xff]  ;;  %v852_v63 = vld [vmem:[%s3330_s1 + $0xf8] sm:$0xff] }
 0x231   :  { %2345 = vpow2.f32 %v787_v2  ;;  %v2917_v11 = vadd.f32 %v2125_v6, %v2734_v50  ;;  %v662_v9 = vpop.f32.mrb[49].mxu1 }
 0x232   :  { %1063 = vrot.lane.b32.xlu1 %v990_v3, %s2432_s25  ;;  %v2921_v43 = vadd.f32 %v2734_v50, %v662_v9  ;;  %v2126_v58 = vpop.f32.mrb[50].mxu1  ;;  %2347 = vpow2.f32 %v783_v4 }
 0x233   :  { %1837 = vst [vmem:[%s3340_s11 + $0x90] sm:$0xff] %v2917_v11  ;;  %v2931_v47 = vadd.f32 %v2126_v58, %v2734_v50  ;;  %v665_v13 = vpop.f32.mrb[51].mxu1 }
 0x234   :  { %933 = vrot.lane.b32.xlu0 %v845_v7, %s2432_s25  ;;  %1835 = vst [vmem:[%s3340_s11 + $0x80] sm:$0xff] %v2921_v43  ;;  %v2939_v14 = vadd.f32 %v2734_v50, %v665_v13  ;;  %v743_v13 = vmul.f32 0.5, %v2917_v11 }
 0x235   :  { %1838 = vst [vmem:[%s3340_s11 + $0x98] sm:$0xff] %v2931_v47 }
 0x236   :  { %935 = vrot.lane.b32.xlu1 %v846_v24, %s2432_s25  ;;  %1836 = vst [vmem:[%s3340_s11 + $0x88] sm:$0xff] %v2939_v14  ;;  %v741_v24 = vmul.f32 0.5, %v2921_v43 }
 0x238   :  { %937 = vrot.lane.b32.xlu0 %v847_v15, %s2432_s25  ;;  %v2129_v19 = vpop.f32.mrb[52].mxu1  ;;  %v789_v15 = vmul.f32 1.442695, %v741_v24 }
 0x239   :  { %v2342_v20 = vpop.eup %2341  ;;  %v2958_v22 = vadd.f32 %v2129_v19, %v2734_v50  ;;  %v678_v23 = vpop.f32.mrb[53].mxu1 }
 0x23a   :  { %v2344_v25 = vpop.eup %2343  ;;  %v995_v26 = vmul.f32 %v2342_v20, %v914_v16  ;;  %939 = vrot.lane.b32.xlu1 %v848_v18, %s2432_s25  ;;  %v2962_v28 = vadd.f32 %v2734_v50, %v678_v23  ;;  %v2130_v29 = vpop.f32.mrb[54].mxu1  ;;  %v793_v18 = vmul.f32 1.442695, %v743_v13  ;;  %2349 = vpow2.f32 %v789_v15 }
 0x23b   :  { %v2346_v30 = vpop.eup %2345  ;;  %1841 = vst [vmem:[%s3340_s11 + $0xb0] sm:$0xff] %v2958_v22  ;;  %v2969_v32 = vadd.f32 %v2130_v29, %v2734_v50  ;;  %v681_v34 = vpop.f32.mrb[55].mxu1  ;;  %v993_v41 = vmul.f32 %v2344_v25, %v910_v10 }
 0x23c   :  { %v996_v35 = vmul.f32 %v2346_v30, %v916_v21  ;;  %1073 = vrot.lane.b32.xlu0 %v995_v26, %s2432_s25  ;;  %1839 = vst [vmem:[%s3340_s11 + $0xa0] sm:$0xff] %v2962_v28  ;;  %v2977_v38 = vadd.f32 %v2734_v50, %v681_v34  ;;  %v2348_v40 = vpop.eup %2347  ;;  %v745_v25 = vmul.f32 0.5, %v2962_v28 }
 0x23d   :  { %1842 = vst [vmem:[%s3340_s11 + $0xb8] sm:$0xff] %v2969_v32  ;;  %v994_v44 = vmul.f32 %v2348_v40, %v912_v31  ;;  %v742_v31 = vmul.f32 0.5, %v2939_v14 }
 0x23e   :  { %1075 = vrot.lane.b32.xlu1 %v996_v35, %s2432_s25  ;;  %1840 = vst [vmem:[%s3340_s11 + $0xa8] sm:$0xff] %v2977_v38 }
 0x23f   :  { %v791_v16 = vmul.f32 1.442695, %v742_v31 }
 0x240   :  { %1069 = vrot.lane.b32.xlu0 %v993_v41, %s2432_s25  ;;  %v2133_v46 = vpop.f32.mrb[56].mxu1  ;;  %v746_v41 = vmul.f32 0.5, %v2977_v38 }
 0x241   :  { %v2993_v49 = vadd.f32 %v2133_v46, %v2734_v50  ;;  %v694_v52 = vpop.f32.mrb[57].mxu1  ;;  %2351 = vpow2.f32 %v791_v16 }
 0x242   :  { %1071 = vrot.lane.b32.xlu1 %v994_v44, %s2432_s25  ;;  %v2997_v53 = vadd.f32 %v2734_v50, %v694_v52  ;;  %v2134_v54 = vpop.f32.mrb[58].mxu1  ;;  %2353 = vpow2.f32 %v793_v18 }
 0x243   :  { %1845 = vst [vmem:[%s3340_s11 + $0xd0] sm:$0xff] %v2993_v49  ;;  %v3007_v59 = vadd.f32 %v2134_v54, %v2734_v50  ;;  %v697_v60 = vpop.f32.mrb[59].mxu1  ;;  %v747_v54 = vmul.f32 0.5, %v2958_v22 }
 0x244   :  { %941 = vrot.lane.b32.xlu0 %v849_v48, %s2432_s25  ;;  %1843 = vst [vmem:[%s3340_s11 + $0xc0] sm:$0xff] %v2997_v53  ;;  %v3015_v61 = vadd.f32 %v2734_v50, %v697_v60  ;;  %v2350_v35 = vpop.eup %2349  ;;  %v749_v16 = vmul.f32 0.5, %v2997_v53 }
 0x245   :  { %1846 = vst [vmem:[%s3340_s11 + $0xd8] sm:$0xff] %v3007_v59 }
 0x246   :  { %943 = vrot.lane.b32.xlu1 %v850_v57, %s2432_s25  ;;  %1844 = vst [vmem:[%s3340_s11 + $0xc8] sm:$0xff] %v3015_v61  ;;  %v797_v57 = vmul.f32 1.442695, %v745_v25 }
 0x248   :  { %945 = vrot.lane.b32.xlu0 %v851_v62, %s2432_s25  ;;  %v2137_v2 = vpop.f32.mrb[60].mxu1 }
 0x249   :  { %v3034_v3 = vadd.f32 %v2137_v2, %v2734_v50  ;;  %v710_v4 = vpop.f32.mrb[61].mxu1 }
 0x24a   :  { %947 = vrot.lane.b32.xlu1 %v852_v63, %s2432_s25  ;;  %v3038_v6 = vadd.f32 %v2734_v50, %v710_v4  ;;  %v2138_v7 = vpop.f32.mrb[62].mxu1 }
 0x24b   :  { %1849 = vst [vmem:[%s3340_s11 + $0xf0] sm:$0xff] %v3034_v3  ;;  %v3045_v10 = vadd.f32 %v2138_v7, %v2734_v50  ;;  %v713_v9 = vpop.f32.mrb[63].mxu1  ;;  %v2352_v52 = vpop.eup %2351  ;;  %v801_v7 = vmul.f32 1.442695, %v747_v54 }
 0x24c   :  { %1847 = vst [vmem:[%s3340_s11 + $0xe0] sm:$0xff] %v3038_v6  ;;  %v3052_v58 = vadd.f32 %v2734_v50, %v713_v9  ;;  %v744_v50 = vmul.f32 0.5, %v2931_v47 }
 0x24d   :  { %1850 = vst [vmem:[%s3340_s11 + $0xf8] sm:$0xff] %v3045_v10 }
 0x24e   :  { %1848 = vst [vmem:[%s3340_s11 + $0xe8] sm:$0xff] %v3052_v58  ;;  %v795_v19 = vmul.f32 1.442695, %v744_v50 }
 0x250   :  { %2355 = vpow2.f32 %v795_v19 }
 0x251   :  { %2357 = vpow2.f32 %v797_v57 }
 0x27d   :  { %v1050_v20 = vpop.permute.xlu0 %1049 }
 0x27e   :  { %v1143_v40 = vadd.f32 %v1050_v20, %v2737_v1  ;;  %v748_v1 = vmul.f32 0.5, %v2969_v32 }
 0x27f   :  { %v1052_v21 = vpop.permute.xlu1 %1051 }
 0x280   :  { %v1144_v26 = vadd.f32 %v1052_v21, %v2748_v39  ;;  %v803_v31 = vmul.f32 1.442695, %v748_v1 }
 0x281   :  { %v1046_v23 = vpop.permute.xlu0 %1045 }
 0x282   :  { %v1141_v30 = vadd.f32 %v1046_v23, %v2740_v17  ;;  %v1174_v60 = vpack.c.bf16 %v1144_v26, %v1143_v40  ;;  %v2354_v17 = vpop.eup %2353  ;;  %v750_v26 = vmul.f32 0.5, %v3015_v61  ;;  %v751_v40 = vmul.f32 0.5, %v2993_v49 }
 0x283   :  { %v1048_v29 = vpop.permute.xlu1 %1047  ;;  %v2356_v4 = vpop.eup %2355 }
 0x284   :  { %v1142_v34 = vadd.f32 %v1048_v29, %v2756_v0  ;;  %v799_v0 = vmul.f32 1.442695, %v746_v41  ;;  %v2358_v23 = vpop.eup %2357  ;;  %v805_v41 = vmul.f32 1.442695, %v749_v16  ;;  %v809_v57 = vmul.f32 1.442695, %v751_v40 }
 0x285   :  { %v918_v44 = vpop.permute.xlu0 %917 }
 0x286   :  { %v1173_v46 = vpack.c.bf16 %v1142_v34, %v1141_v30  ;;  %v997_v48 = vmul.f32 %v2350_v35, %v918_v44  ;;  %2359 = vpow2.f32 %v799_v0 }
 0x287   :  { %v920_v39 = vpop.permute.xlu1 %919  ;;  %2361 = vpow2.f32 %v801_v7 }
 0x288   :  { %v998_v62 = vmul.f32 %v2352_v52, %v920_v39  ;;  %2147 = vmatprep.mubr.msk.bf16.mxu1 %vm1228_vm0, %v1173_v46  ;;  %1077 = vrot.lane.b32.xlu0 %v997_v48, %s2432_s25  ;;  %2363 = vpow2.f32 %v803_v31 }
 0x289   :  { %2148 = vmatmul.mubr.msk.bf16.vlgmr.msra.gmra.mrb[64].mxu1 %vm1228_vm0, %v1174_v60  ;;  %v922_v63 = vpop.permute.xlu0 %921  ;;  %2365 = vpow2.f32 %v805_v41 }
 0x28a   :  { %v999_v2 = vmul.f32 %v2354_v17, %v922_v63  ;;  %1079 = vrot.lane.b32.xlu1 %v998_v62, %s2432_s25  ;;  %v753_v63 = vmul.f32 0.5, %v3038_v6 }
 0x28b   :  { %v924_v9 = vpop.permute.xlu1 %923 }
 0x28c   :  { %v1000_v24 = vmul.f32 %v2356_v4, %v924_v9  ;;  %1081 = vrot.lane.b32.xlu0 %v999_v2, %s2432_s25 }
 0x28e   :  { %v1058_v13 = vpop.permute.xlu0 %1057  ;;  %1083 = vrot.lane.b32.xlu1 %v1000_v24, %s2432_s25 }
 0x28f   :  { %v1147_v25 = vadd.f32 %v1058_v13, %v2775_v27  ;;  %v807_v27 = vmul.f32 1.442695, %v750_v26  ;;  %v754_v13 = vmul.f32 0.5, %v3052_v58 }
 0x290   :  { %v1060_v15 = vpop.permute.xlu1 %1059  ;;  %v2360_v35 = vpop.eup %2359 }
 0x291   :  { %v1148_v18 = vadd.f32 %v1060_v15, %v2786_v37  ;;  %2367 = vpow2.f32 %v807_v27 }
 0x292   :  { %v1054_v50 = vpop.permute.xlu0 %1053  ;;  %2369 = vpow2.f32 %v809_v57  ;;  %v2229_v57 = vld [vmem:[%s3337_s8] ss:$8 sps:$4 sm:$0xff]  }
 0x293   :  { %v1145_v20 = vadd.f32 %v1054_v50, %v2778_v33  ;;  %v1176_v44 = vpack.c.bf16 %v1148_v18, %v1147_v25  ;;  %v2362_v33 = vpop.eup %2361 }
 0x294   :  { %v1056_v19 = vpop.permute.xlu1 %1055  ;;  %v2364_v54 = vpop.eup %2363 }
 0x295   :  { %v1146_v21 = vadd.f32 %v1056_v19, %v2794_v42  ;;  %v752_v42 = vmul.f32 0.5, %v3007_v59  ;;  %v2366_v24 = vpop.eup %2365  ;;  %v755_v19 = vmul.f32 0.5, %v3034_v3 }
 0x296   :  { %v926_v29 = vpop.permute.xlu0 %925 }
 0x297   :  { %v1175_v30 = vpack.c.bf16 %v1146_v21, %v1145_v20  ;;  %v1001_v34 = vmul.f32 %v2358_v23, %v926_v29  ;;  %v811_v62 = vmul.f32 1.442695, %v752_v42  ;;  %v813_v20 = vmul.f32 1.442695, %v753_v63  ;;  %v2232_v63 = vld [vmem:[%s3337_s8 + $0x10] ss:$8 sps:$4 sm:$0xff]  }
 0x298   :  { %v928_v46 = vpop.permute.xlu1 %927 }
 0x299   :  { %v1002_v37 = vmul.f32 %v2360_v35, %v928_v46  ;;  %2151 = vmatprep.mubr.msk.bf16.mxu1 %vm1228_vm0, %v1175_v30  ;;  %1085 = vrot.lane.b32.xlu0 %v1001_v34, %s2432_s25  ;;  %2371 = vpow2.f32 %v811_v62  ;;  %v817_v30 = vmul.f32 1.442695, %v755_v19  ;;  %v2244_v19 = vld [vmem:[%s3337_s8 + $0x50] ss:$8 sps:$4 sm:$0xff]  }
 0x29a   :  { %2152 = vmatmul.mubr.msk.bf16.gmra.mrb[68].mxu1 %vm1228_vm0, %v1176_v44  ;;  %v930_v48 = vpop.permute.xlu0 %929  ;;  %2373 = vpow2.f32 %v813_v20  ;;  %v2249_v20 = vld [vmem:[%s3337_s8 + $0x64] ss:$8 sps:$4 sm:$0xff]  }
 0x29b   :  { %v1003_v52 = vmul.f32 %v2362_v33, %v930_v48  ;;  %1087 = vrot.lane.b32.xlu1 %v1002_v37, %s2432_s25  ;;  %v2368_v18 = vpop.eup %2367 }
 0x29c   :  { %v932_v60 = vpop.permute.xlu1 %931 }
 0x29d   :  { %v1004_v39 = vmul.f32 %v2364_v54, %v932_v60  ;;  %1089 = vrot.lane.b32.xlu0 %v1003_v52, %s2432_s25  ;;  %v2231_v60 = vld [vmem:[%s3337_s8 + $0x4] ss:$8 sps:$4 sm:$0xff]  }
 0x29e   :  { %v1066_v17 = vpop.permute.xlu0 %1065  ;;  %1562 = vmatprep.subr.bf16.mxu0 %v2231_v60 }
 0x29f   :  { %1091 = vrot.lane.b32.xlu1 %v1004_v39, %s2432_s25  ;;  %v1151_v31 = vadd.f32 %v1066_v17, %v2826_v5  ;;  %v815_v5 = vmul.f32 1.442695, %v754_v13  ;;  %1563 = vmatpush1.bf16.msra.mxu0 %v2229_v57  ;;  %v2240_v13 = vld [vmem:[%s3337_s8 + $0x34] ss:$8 sps:$4 sm:$0xff]  }
 0x2a0   :  { %v1068_v1 = vpop.permute.xlu1 %1067 }
 0x2a1   :  { %v1152_v2 = vadd.f32 %v1068_v1, %v2838_v8  ;;  %2375 = vpow2.f32 %v815_v5 }
 0x2a2   :  { %v1062_v0 = vpop.permute.xlu0 %1061  ;;  %2377 = vpow2.f32 %v817_v30 }
 0x2a3   :  { %v1149_v7 = vadd.f32 %v1062_v0, %v2829_v12  ;;  %v1178_v21 = vpack.c.bf16 %v1152_v2, %v1151_v31  ;;  %v2370_v12 = vpop.eup %2369  ;;  %v2235_v31 = vld [vmem:[%s3337_s8 + $0x20] ss:$8 sps:$4 sm:$0xff]  }
 0x2a4   :  { %v1064_v4 = vpop.permute.xlu1 %1063  ;;  %v2372_v29 = vpop.eup %2371 }
 0x2a5   :  { %v1150_v9 = vadd.f32 %v1064_v4, %v2846_v55  ;;  %v756_v55 = vmul.f32 0.5, %v3045_v10  ;;  %v2374_v48 = vpop.eup %2373  ;;  %v2237_v4 = vld [vmem:[%s3337_s8 + $0x24] ss:$8 sps:$4 sm:$0xff]  }
 0x2a6   :  { %v934_v15 = vpop.permute.xlu0 %933 }
 0x2a7   :  { %v1177_v50 = vpack.c.bf16 %v1150_v9, %v1149_v7  ;;  %v1005_v16 = vmul.f32 %v2366_v24, %v934_v15  ;;  %v819_v40 = vmul.f32 1.442695, %v756_v55  ;;  %v2238_v15 = vld [vmem:[%s3337_s8 + $0x30] ss:$8 sps:$4 sm:$0xff]  }
 0x2a8   :  { %v936_v23 = vpop.permute.xlu1 %935 }
 0x2a9   :  { %v1006_v8 = vmul.f32 %v2368_v18, %v936_v23  ;;  %2155 = vmatprep.mubr.msk.bf16.mxu1 %vm1228_vm0, %v1177_v50  ;;  %1093 = vrot.lane.b32.xlu0 %v1005_v16, %s2432_s25  ;;  %2379 = vpow2.f32 %v819_v40  ;;  %v2243_v50 = vld [vmem:[%s3337_s8 + $0x44] ss:$8 sps:$4 sm:$0xff]   ;;  %v2241_v16 = vld [vmem:[%s3337_s8 + $0x40] ss:$8 sps:$4 sm:$0xff]   ;;  %v2246_v18 = vld [vmem:[%s3337_s8 + $0x54] ss:$8 sps:$4 sm:$0xff]  }
 0x2aa   :  { %2156 = vmatmul.mubr.msk.bf16.gmra.mrb[72].mxu1 %vm1228_vm0, %v1178_v21  ;;  %v938_v25 = vpop.permute.xlu0 %937  ;;  %v2247_v21 = vld [vmem:[%s3337_s8 + $0x60] ss:$8 sps:$4 sm:$0xff]   ;;  %v2252_v23 = vld [vmem:[%s3337_s8 + $0x74] ss:$8 sps:$4 sm:$0xff]  }
 0x2ab   :  { %v1007_v26 = vmul.f32 %v2370_v12, %v938_v25  ;;  %1095 = vrot.lane.b32.xlu1 %v1006_v8, %s2432_s25  ;;  %v2250_v8 = vld [vmem:[%s3337_s8 + $0x70] ss:$8 sps:$4 sm:$0xff]   ;;  %v2433_v12 = vmov 0  }
 0x2ac   :  { %v940_v34 = vpop.permute.xlu1 %939  ;;  %1594 = vmatprep.mubr.bf16.mxu0 %v2433_v12 }
 0x2ad   :  { %v1008_v35 = vmul.f32 %v2372_v29, %v940_v34  ;;  %1097 = vrot.lane.b32.xlu0 %v1007_v26, %s2432_s25 }
 0x2ae   :  { %v1074_v41 = vpop.permute.xlu0 %1073 }
 0x2af   :  { %1099 = vrot.lane.b32.xlu1 %v1008_v35, %s2432_s25  ;;  %v1155_v52 = vadd.f32 %v1074_v41, %v2878_v36 }
 0x2b0   :  { %v1076_v44 = vpop.permute.xlu1 %1075 }
 0x2b1   :  { %v1156_v37 = vadd.f32 %v1076_v44, %v2890_v51  ;;  %v2376_v51 = vpop.eup %2375 }
 0x2b2   :  { %v1070_v46 = vpop.permute.xlu0 %1069  ;;  %v2378_v1 = vpop.eup %2377 }
 0x2b3   :  { %v1153_v42 = vadd.f32 %v1070_v46, %v2881_v45  ;;  %v2234_v45 = vld [vmem:[%s3337_s8 + $0x14] ss:$8 sps:$4 sm:$0xff]   ;;  %v2380_v7 = vpop.eup %2379 }
 0x2b4   :  { %v1072_v33 = vpop.permute.xlu1 %1071  ;;  %1564 = vmatprep.subr.bf16.mxu0 %v2234_v45 }
 0x2b5   :  { %v1154_v27 = vadd.f32 %v1072_v33, %v2898_v56  ;;  %v1180_v56 = vpack.c.bf16 %v1156_v37, %v1155_v52  ;;  %1565 = vmatpush1.bf16.msra.mxu0 %v2232_v63 }
 0x2b6   :  { %v942_v54 = vpop.permute.xlu0 %941  ;;  %1566 = vmatprep.subr.bf16.mxu0 %v2237_v4 }
 0x2b7   :  { %v1179_v39 = vpack.c.bf16 %v1154_v27, %v1153_v42  ;;  %v1009_v62 = vmul.f32 %v2374_v48, %v942_v54 }
 0x2b8   :  { %v944_v17 = vpop.permute.xlu1 %943 }
 0x2b9   :  { %v1010_v36 = vmul.f32 %v2376_v51, %v944_v17  ;;  %2159 = vmatprep.mubr.msk.bf16.mxu1 %vm1228_vm0, %v1179_v39  ;;  %1101 = vrot.lane.b32.xlu0 %v1009_v62, %s2432_s25 }
 0x2ba   :  { %2160 = vmatmul.mubr.msk.bf16.gmra.mrb[76].mxu1 %vm1228_vm0, %v1180_v56  ;;  %v946_v0 = vpop.permute.xlu0 %945  ;;  %1567 = vmatpush1.bf16.msra.mxu0 %v2235_v31 }
 0x2bb   :  { %v1011_v2 = vmul.f32 %v2378_v1, %v946_v0  ;;  %1103 = vrot.lane.b32.xlu1 %v1010_v36, %s2432_s25  ;;  %1568 = vmatprep.subr.bf16.mxu0 %v2240_v13  ;;  %v3194_v0 = vld [vmem:[%s3336_s7] ss:$0 sm:$0xff] }
 0x2bc   :  { %v948_v9 = vpop.permute.xlu1 %947 }
 0x2bd   :  { %v1012_v24 = vmul.f32 %v2380_v7, %v948_v9  ;;  %1105 = vrot.lane.b32.xlu0 %v1011_v2, %s2432_s25 }
 0x2be   :  { %1569 = vmatpush1.bf16.msra.mxu0 %v2238_v15 }
 0x2bf   :  { %1107 = vrot.lane.b32.xlu1 %v1012_v24, %s2432_s25  ;;  %1570 = vmatprep.subr.bf16.mxu0 %v2243_v50 }
 0x2c2   :  { %1571 = vmatpush1.bf16.msra.mxu0 %v2241_v16 }
 0x2c3   :  { %1572 = vmatprep.subr.bf16.mxu0 %v2246_v18 }
 0x2c6   :  { %1573 = vmatpush1.bf16.msra.mxu0 %v2244_v19 }
 0x2c7   :  { %1574 = vmatprep.subr.bf16.mxu0 %v2249_v20 }
 0x2ca   :  { %1575 = vmatpush1.bf16.msra.mxu0 %v2247_v21 }
 0x2cb   :  { %1576 = vmatprep.subr.bf16.mxu0 %v2252_v23 }
 0x2ce   :  { %1577 = vmatpush1.bf16.msra.mxu0 %v2250_v8 }
 0x2fa   :  { %v1078_v55 = vpop.permute.xlu0 %1077 }
 0x2fb   :  { %v1157_v25 = vadd.f32 %v1078_v55, %v2921_v43 }
 0x2fc   :  { %v1080_v5 = vpop.permute.xlu1 %1079 }
 0x2fd   :  { %v1158_v26 = vadd.f32 %v1080_v5, %v2939_v14 }
 0x2fe   :  { %v1082_v29 = vpop.permute.xlu0 %1081 }
 0x2ff   :  { %v1181_v30 = vpack.c.bf16 %v1158_v26, %v1157_v25  ;;  %v1159_v35 = vadd.f32 %v1082_v29, %v2917_v11 }
 0x300   :  { %v1084_v34 = vpop.permute.xlu1 %1083 }
 0x301   :  { %v1160_v40 = vadd.f32 %v1084_v34, %v2931_v47  ;;  %2163 = vmatprep.mubr.msk.bf16.mxu1 %vm1228_vm0, %v1181_v30 }
 0x303   :  { %v1182_v41 = vpack.c.bf16 %v1160_v40, %v1159_v35 }
 0x305   :  { %2164 = vmatmul.mubr.msk.bf16.gmra.mrb[80].mxu1 %vm1228_vm0, %v1182_v41 }
 0x30b   :  { %v1086_v44 = vpop.permute.xlu0 %1085 }
 0x30c   :  { %v1161_v37 = vadd.f32 %v1086_v44, %v2962_v28 }
 0x30d   :  { %v1088_v46 = vpop.permute.xlu1 %1087 }
 0x30e   :  { %v1162_v43 = vadd.f32 %v1088_v46, %v2977_v38 }
 0x30f   :  { %v1090_v33 = vpop.permute.xlu0 %1089 }
 0x310   :  { %v1183_v14 = vpack.c.bf16 %v1162_v43, %v1161_v37  ;;  %v1163_v27 = vadd.f32 %v1090_v33, %v2958_v22 }
 0x311   :  { %v1092_v42 = vpop.permute.xlu1 %1091 }
 0x312   :  { %v1164_v11 = vadd.f32 %v1092_v42, %v2969_v32  ;;  %2167 = vmatprep.mubr.msk.bf16.mxu1 %vm1228_vm0, %v1183_v14 }
 0x314   :  { %v1184_v47 = vpack.c.bf16 %v1164_v11, %v1163_v27 }
 0x316   :  { %2168 = vmatmul.mubr.msk.bf16.gmra.mrb[84].mxu1 %vm1228_vm0, %v1184_v47 }
 0x31b   :  { %v1094_v48 = vpop.permute.xlu0 %1093 }
 0x31c   :  { %v1165_v54 = vadd.f32 %v1094_v48, %v2997_v53 }
 0x31d   :  { %v1096_v52 = vpop.permute.xlu1 %1095 }
 0x31e   :  { %v1166_v28 = vadd.f32 %v1096_v52, %v3015_v61 }
 0x31f   :  { %v1098_v57 = vpop.permute.xlu0 %1097 }
 0x320   :  { %v1185_v38 = vpack.c.bf16 %v1166_v28, %v1165_v54  ;;  %v1167_v39 = vadd.f32 %v1098_v57, %v2993_v49 }
 0x321   :  { %v1100_v60 = vpop.permute.xlu1 %1099 }
 0x322   :  { %v1168_v22 = vadd.f32 %v1100_v60, %v3007_v59  ;;  %2171 = vmatprep.mubr.msk.bf16.mxu1 %vm1228_vm0, %v1185_v38 }
 0x324   :  { %v1186_v32 = vpack.c.bf16 %v1168_v22, %v1167_v39 }
 0x326   :  { %2172 = vmatmul.mubr.msk.bf16.gmra.mrb[88].mxu1 %vm1228_vm0, %v1186_v32 }
 0x32b   :  { %v1102_v62 = vpop.permute.xlu0 %1101 }
 0x32c   :  { %v1169_v51 = vadd.f32 %v1102_v62, %v3038_v6 }
 0x32d   :  { %v1104_v45 = vpop.permute.xlu1 %1103 }
 0x32e   :  { %v1170_v53 = vadd.f32 %v1104_v45, %v3052_v58 }
 0x32f   :  { %v1106_v56 = vpop.permute.xlu0 %1105 }
 0x330   :  { %v1187_v61 = vpack.c.bf16 %v1170_v53, %v1169_v51  ;;  %v1171_v36 = vadd.f32 %v1106_v56, %v3034_v3 }
 0x331   :  { %v1108_v17 = vpop.permute.xlu1 %1107 }
 0x332   :  { %v1172_v49 = vadd.f32 %v1108_v17, %v3045_v10  ;;  %2175 = vmatprep.mubr.msk.bf16.mxu1 %vm1228_vm0, %v1187_v61 }
 0x334   :  { %v1188_v59 = vpack.c.bf16 %v1172_v49, %v1171_v36 }
 0x336   :  { %2176 = vmatmul.mubr.msk.bf16.gmra.mrb[92].mxu1 %vm1228_vm0, %v1188_v59 }
 0x35c   :  { %v2149_v1 = vpop.f32.mrb[64].mxu1 }
 0x35d   :  { %v1311_v6 = vpop.f32.mrb[65].mxu1  ;;  %v1320_v63 = vadd.f32 %v2149_v1, %v3194_v0 }
 0x35e   :  { %v2150_v58 = vpop.f32.mrb[66].mxu1  ;;  %v1312_v10 = vadd.f32 %v3194_v0, %v1311_v6 }
 0x35f   :  { %v1323_v2 = vadd.f32 %v2150_v58, %v3194_v0  ;;  %v1314_v3 = vpop.f32.mrb[67].mxu1 }
 0x360   :  { %v1315_v4 = vadd.f32 %v3194_v0, %v1314_v3 }
 0x361   :  { %v1439_v7 = vpack.c.bf16 %v1323_v2, %v1320_v63 }
 0x362   :  { %v1438_v9 = vpack.c.bf16 %v1315_v4, %v1312_v10 }
 0x364   :  { %1595 = vmatmul.mubr.bf16.vlgmr.msra.gmra.mrb[32].mxu0 %v1438_v9 }
 0x365   :  { %1604 = vmatprep.mubr.bf16.mxu0 %v2433_v12 }
 0x36c   :  { %1605 = vmatmul.mubr.bf16.gmra.mrb[36].mxu0 %v1439_v7 }
 0x36d   :  { %v2153_v24 = vpop.f32.mrb[68].mxu1  ;;  %1614 = vmatprep.mubr.bf16.mxu0 %v2433_v12 }
 0x36e   :  { %v1327_v31 = vpop.f32.mrb[69].mxu1  ;;  %v1336_v15 = vadd.f32 %v2153_v24, %v3194_v0 }
 0x36f   :  { %v2154_v13 = vpop.f32.mrb[70].mxu1  ;;  %v1328_v18 = vadd.f32 %v3194_v0, %v1327_v31 }
 0x370   :  { %v1339_v50 = vadd.f32 %v2154_v13, %v3194_v0  ;;  %v1330_v16 = vpop.f32.mrb[71].mxu1 }
 0x371   :  { %v1331_v19 = vadd.f32 %v3194_v0, %v1330_v16 }
 0x372   :  { %v1441_v20 = vpack.c.bf16 %v1339_v50, %v1336_v15 }
 0x373   :  { %v1440_v21 = vpack.c.bf16 %v1331_v19, %v1328_v18 }
 0x375   :  { %1615 = vmatmul.mubr.bf16.gmra.mrb[40].mxu0 %v1440_v21 }
 0x376   :  { %1624 = vmatprep.mubr.bf16.mxu0 %v2433_v12 }
 0x37d   :  { %v2157_v23 = vpop.f32.mrb[72].mxu1  ;;  %1625 = vmatmul.mubr.bf16.gmra.mrb[44].mxu0 %v1441_v20  ;;  %v1472_v20 = vlaneseq }
 0x37e   :  { %v1343_v8 = vpop.f32.mrb[73].mxu1  ;;  %1634 = vmatprep.mubr.bf16.mxu0 %v2433_v12  ;;  %v1352_v5 = vadd.f32 %v2157_v23, %v3194_v0 }
 0x37f   :  { %v2158_v55 = vpop.f32.mrb[74].mxu1  ;;  %v1344_v29 = vadd.f32 %v3194_v0, %v1343_v8  ;;  %v1473_v21 = vshrl.u32 %v1472_v20, 7  ;;  %v1470_v8 = vld [vmem:[%s3338_s9] sm:$0x3]  ;;  %s2434_s9 = smov [#allocation5]  }
 0x380   :  { %v1355_v25 = vadd.f32 %v2158_v55, %v3194_v0  ;;  %v1346_v26 = vpop.f32.mrb[75].mxu1  ;;  %s1856_s18 = sshll.u32 %s2434_s9, 4  ;;  %s1857_s18 = int_to_ptr.vmem [resolvable:$true] %s1856_s18 }
 0x381   :  { %v1347_v30 = vadd.f32 %v3194_v0, %v1346_v26  ;;  %v1474_v23 = vsub.s32 0, %v1473_v21  ;;  %v1478_v55 = vsub.s32 1, %v1473_v21  ;;  %s2403_s21 = scalar_lea.vmem %s1857_s18, 8192  ;;  %p2408_p9 = scmp.lt.s32.totalorder %s1857_s18, %s1857_s18 }
 0x382   :  { %v1443_v34 = vpack.c.bf16 %v1355_v25, %v1352_v5  ;;  %p2404_p8 = scmp.ne.s32.totalorder %s1857_s18, %s2403_s21  ;;  %p2409_p10 = scmp.lt.s32.totalorder %s2403_s21, %s2403_s21 }
 0x383   :  { %v1442_v35 = vpack.c.bf16 %v1347_v30, %v1344_v29  ;;  %v3246_v5 = vrot.slane %v1470_v8, %v1474_v23  ;;  %v3248_v25 = vrot.slane %v1470_v8, %v1478_v55 }
 0x384   :  { %p2410_p11 = por %p2409_p10, %p2408_p9 }
 0x385   :  { %1635 = vmatmul.mubr.bf16.gmra.mrb[48].mxu0 %v1442_v35 }
 0x386   :  { %1644 = vmatprep.mubr.bf16.mxu0 %v2433_v12  ;;  %p2411_p12 = pnand %p2410_p11, %p2404_p8 }
 0x38d   :  { %v2161_v40 = vpop.f32.mrb[76].mxu1  ;;  %1645 = vmatmul.mubr.bf16.gmra.mrb[52].mxu0 %v1443_v34 }
 0x38e   :  { %v1359_v41 = vpop.f32.mrb[77].mxu1  ;;  %1654 = vmatprep.mubr.bf16.mxu0 %v2433_v12  ;;  %v1368_v46 = vadd.f32 %v2161_v40, %v3194_v0 }
 0x38f   :  { %v2162_v44 = vpop.f32.mrb[78].mxu1  ;;  %v1360_v33 = vadd.f32 %v3194_v0, %v1359_v41 }
 0x390   :  { %v1371_v37 = vadd.f32 %v2162_v44, %v3194_v0  ;;  %v1362_v43 = vpop.f32.mrb[79].mxu1 }
 0x391   :  { %v1363_v14 = vadd.f32 %v3194_v0, %v1362_v43 }
 0x392   :  { %v1445_v42 = vpack.c.bf16 %v1371_v37, %v1368_v46 }
 0x393   :  { %v1444_v27 = vpack.c.bf16 %v1363_v14, %v1360_v33 }
 0x395   :  { %1655 = vmatmul.mubr.bf16.gmra.mrb[56].mxu0 %v1444_v27 }
 0x396   :  { %1664 = vmatprep.mubr.bf16.mxu0 %v2433_v12 }
 0x39d   :  { %1665 = vmatmul.mubr.bf16.gmra.mrb[60].mxu0 %v1445_v42 }
 0x39e   :  { %1674 = vmatprep.mubr.bf16.mxu0 %v2433_v12 }
 0x3d8   :  { %v2165_v11 = vpop.f32.mrb[80].mxu1 }
 0x3d9   :  { %v1375_v47 = vpop.f32.mrb[81].mxu1  ;;  %v1384_v52 = vadd.f32 %v2165_v11, %v3194_v0 }
 0x3da   :  { %v2166_v48 = vpop.f32.mrb[82].mxu1  ;;  %v1376_v57 = vadd.f32 %v3194_v0, %v1375_v47 }
 0x3db   :  { %v1387_v54 = vadd.f32 %v2166_v48, %v3194_v0  ;;  %v1378_v28 = vpop.f32.mrb[83].mxu1 }
 0x3dc   :  { %v1379_v38 = vadd.f32 %v3194_v0, %v1378_v28 }
 0x3dd   :  { %v1447_v60 = vpack.c.bf16 %v1387_v54, %v1384_v52 }
 0x3de   :  { %v1446_v39 = vpack.c.bf16 %v1379_v38, %v1376_v57 }
 0x3e0   :  { %1675 = vmatmul.mubr.bf16.gmra.mrb[64].mxu0 %v1446_v39 }
 0x3e1   :  { %1684 = vmatprep.mubr.bf16.mxu0 %v2433_v12 }
 0x3e8   :  { %1685 = vmatmul.mubr.bf16.gmra.mrb[68].mxu0 %v1447_v60 }
 0x3e9   :  { %v2169_v22 = vpop.f32.mrb[84].mxu1  ;;  %1694 = vmatprep.mubr.bf16.mxu0 %v2433_v12 }
 0x3ea   :  { %v1391_v32 = vpop.f32.mrb[85].mxu1  ;;  %v1400_v45 = vadd.f32 %v2169_v22, %v3194_v0 }
 0x3eb   :  { %v2170_v62 = vpop.f32.mrb[86].mxu1  ;;  %v1392_v56 = vadd.f32 %v3194_v0, %v1391_v32 }
 0x3ec   :  { %v1403_v51 = vadd.f32 %v2170_v62, %v3194_v0  ;;  %v1394_v53 = vpop.f32.mrb[87].mxu1 }
 0x3ed   :  { %v1395_v61 = vadd.f32 %v3194_v0, %v1394_v53 }
 0x3ee   :  { %v1449_v17 = vpack.c.bf16 %v1403_v51, %v1400_v45 }
 0x3ef   :  { %v1448_v36 = vpack.c.bf16 %v1395_v61, %v1392_v56 }
 0x3f1   :  { %1695 = vmatmul.mubr.bf16.gmra.mrb[72].mxu0 %v1448_v36 }
 0x3f2   :  { %1704 = vmatprep.mubr.bf16.mxu0 %v2433_v12 }
 0x3f9   :  { %v2173_v49 = vpop.f32.mrb[88].mxu1  ;;  %1705 = vmatmul.mubr.bf16.gmra.mrb[76].mxu0 %v1449_v17 }
 0x3fa   :  { %v1407_v59 = vpop.f32.mrb[89].mxu1  ;;  %1714 = vmatprep.mubr.bf16.mxu0 %v2433_v12  ;;  %v1416_v6 = vadd.f32 %v2173_v49, %v3194_v0 }
 0x3fb   :  { %v2174_v1 = vpop.f32.mrb[90].mxu1  ;;  %v1408_v2 = vadd.f32 %v3194_v0, %v1407_v59 }
 0x3fc   :  { %v1419_v58 = vadd.f32 %v2174_v1, %v3194_v0  ;;  %v1410_v63 = vpop.f32.mrb[91].mxu1 }
 0x3fd   :  { %v1411_v3 = vadd.f32 %v3194_v0, %v1410_v63 }
 0x3fe   :  { %v1451_v10 = vpack.c.bf16 %v1419_v58, %v1416_v6 }
 0x3ff   :  { %v1450_v4 = vpack.c.bf16 %v1411_v3, %v1408_v2 }
 0x401   :  { %1715 = vmatmul.mubr.bf16.gmra.mrb[80].mxu0 %v1450_v4 }
 0x402   :  { %1724 = vmatprep.mubr.bf16.mxu0 %v2433_v12 }
 0x409   :  { %v2177_v7 = vpop.f32.mrb[92].mxu1  ;;  %1725 = vmatmul.mubr.bf16.gmra.mrb[84].mxu0 %v1451_v10 }
 0x40a   :  { %v1423_v9 = vpop.f32.mrb[93].mxu1  ;;  %1734 = vmatprep.mubr.bf16.mxu0 %v2433_v12  ;;  %v1432_v31 = vadd.f32 %v2177_v7, %v3194_v0 }
 0x40b   :  { %v2178_v24 = vpop.f32.mrb[94].mxu1  ;;  %v1424_v50 = vadd.f32 %v3194_v0, %v1423_v9 }
 0x40c   :  { %v1435_v13 = vadd.f32 %v2178_v24, %v3194_v0  ;;  %v1426_v15 = vpop.f32.mrb[95].mxu1 }
 0x40d   :  { %v1427_v16 = vadd.f32 %v3194_v0, %v1426_v15 }
 0x40e   :  { %v1453_v18 = vpack.c.bf16 %v1435_v13, %v1432_v31 }
 0x40f   :  { %v1452_v19 = vpack.c.bf16 %v1427_v16, %v1424_v50 }
 0x411   :  { %1735 = vmatmul.mubr.bf16.gmra.mrb[88].mxu0 %v1452_v19 }
 0x412   :  { %1744 = vmatprep.mubr.bf16.mxu0 %v2433_v12 }
 0x419   :  { %1745 = vmatmul.mubr.bf16.gmra.mrb[92].mxu0 %v1453_v18 }
 0x437   :  { %v1596_v26 = vpop.f32.mrb[32].mxu0 }
 0x438   :  { %v1597_v0 = vadd.f32 %v1596_v26, %v3246_v5  ;;  %v1598_v29 = vpop.f32.mrb[33].mxu0 }
 0x439   :  { %v1599_v30 = vadd.f32 %v1598_v29, %v3248_v25  ;;  %v1600_v12 = vpop.f32.mrb[34].mxu0 }
 0x43a   :  { %1755 = vst [vmem:[#allocation5] sm:$0xff] %v1597_v0  ;;  %v1601_v34 = vadd.f32 %v1600_v12, %v3246_v5  ;;  %v1602_v35 = vpop.f32.mrb[35].mxu0 }
 0x43b   :  { %1756 = vst [vmem:[#allocation5 + $0x8] sm:$0xff] %v1599_v30  ;;  %v1603_v40 = vadd.f32 %v1602_v35, %v3248_v25 }
 0x43c   :  { %1757 = vst [vmem:[#allocation5 + $0x10] sm:$0xff] %v1601_v34 }
 0x43d   :  { %1758 = vst [vmem:[#allocation5 + $0x18] sm:$0xff] %v1603_v40 }
 0x43f   :  { %v1606_v41 = vpop.f32.mrb[36].mxu0 }
 0x440   :  { %v1607_v44 = vadd.f32 %v1606_v41, %v3246_v5  ;;  %v1608_v46 = vpop.f32.mrb[37].mxu0 }
 0x441   :  { %v1609_v37 = vadd.f32 %v1608_v46, %v3248_v25  ;;  %v1610_v43 = vpop.f32.mrb[38].mxu0 }
 0x442   :  { %1759 = vst [vmem:[#allocation5 + $0x20] sm:$0xff] %v1607_v44  ;;  %v1611_v33 = vadd.f32 %v1610_v43, %v3246_v5  ;;  %v1612_v14 = vpop.f32.mrb[39].mxu0 }
 0x443   :  { %1760 = vst [vmem:[#allocation5 + $0x28] sm:$0xff] %v1609_v37  ;;  %v1613_v42 = vadd.f32 %v1612_v14, %v3248_v25 }
 0x444   :  { %1761 = vst [vmem:[#allocation5 + $0x30] sm:$0xff] %v1611_v33 }
 0x445   :  { %1762 = vst [vmem:[#allocation5 + $0x38] sm:$0xff] %v1613_v42 }
 0x448   :  { %v1616_v27 = vpop.f32.mrb[40].mxu0 }
 0x449   :  { %v1617_v11 = vadd.f32 %v1616_v27, %v3246_v5  ;;  %v1618_v47 = vpop.f32.mrb[41].mxu0 }
 0x44a   :  { %v1619_v48 = vadd.f32 %v1618_v47, %v3248_v25  ;;  %v1620_v52 = vpop.f32.mrb[42].mxu0 }
 0x44b   :  { %1763 = vst [vmem:[#allocation5 + $0x40] sm:$0xff] %v1617_v11  ;;  %v1621_v54 = vadd.f32 %v1620_v52, %v3246_v5  ;;  %v1622_v28 = vpop.f32.mrb[43].mxu0 }
 0x44c   :  { %1764 = vst [vmem:[#allocation5 + $0x48] sm:$0xff] %v1619_v48  ;;  %v1623_v57 = vadd.f32 %v1622_v28, %v3248_v25 }
 0x44d   :  { %1765 = vst [vmem:[#allocation5 + $0x50] sm:$0xff] %v1621_v54 }
 0x44e   :  { %1766 = vst [vmem:[#allocation5 + $0x58] sm:$0xff] %v1623_v57 }
 0x450   :  { %v1626_v38 = vpop.f32.mrb[44].mxu0 }
 0x451   :  { %v1627_v60 = vadd.f32 %v1626_v38, %v3246_v5  ;;  %v1628_v39 = vpop.f32.mrb[45].mxu0 }
 0x452   :  { %v1629_v22 = vadd.f32 %v1628_v39, %v3248_v25  ;;  %v1630_v32 = vpop.f32.mrb[46].mxu0 }
 0x453   :  { %1767 = vst [vmem:[#allocation5 + $0x60] sm:$0xff] %v1627_v60  ;;  %v1631_v62 = vadd.f32 %v1630_v32, %v3246_v5  ;;  %v1632_v45 = vpop.f32.mrb[47].mxu0 }
 0x454   :  { %1768 = vst [vmem:[#allocation5 + $0x68] sm:$0xff] %v1629_v22  ;;  %v1633_v51 = vadd.f32 %v1632_v45, %v3248_v25 }
 0x455   :  { %1769 = vst [vmem:[#allocation5 + $0x70] sm:$0xff] %v1631_v62 }
 0x456   :  { %1770 = vst [vmem:[#allocation5 + $0x78] sm:$0xff] %v1633_v51 }
 0x458   :  { %v1636_v53 = vpop.f32.mrb[48].mxu0 }
 0x459   :  { %v1637_v56 = vadd.f32 %v1636_v53, %v3246_v5  ;;  %v1638_v61 = vpop.f32.mrb[49].mxu0 }
 0x45a   :  { %v1639_v17 = vadd.f32 %v1638_v61, %v3248_v25  ;;  %v1640_v36 = vpop.f32.mrb[50].mxu0 }
 0x45b   :  { %1771 = vst [vmem:[#allocation5 + $0x80] sm:$0xff] %v1637_v56  ;;  %v1641_v49 = vadd.f32 %v1640_v36, %v3246_v5  ;;  %v1642_v59 = vpop.f32.mrb[51].mxu0 }
 0x45c   :  { %1772 = vst [vmem:[#allocation5 + $0x88] sm:$0xff] %v1639_v17  ;;  %v1643_v1 = vadd.f32 %v1642_v59, %v3248_v25 }
 0x45d   :  { %1773 = vst [vmem:[#allocation5 + $0x90] sm:$0xff] %v1641_v49 }
 0x45e   :  { %1774 = vst [vmem:[#allocation5 + $0x98] sm:$0xff] %v1643_v1 }
 0x460   :  { %v1646_v6 = vpop.f32.mrb[52].mxu0 }
 0x461   :  { %v1647_v58 = vadd.f32 %v1646_v6, %v3246_v5  ;;  %v1648_v63 = vpop.f32.mrb[53].mxu0 }
 0x462   :  { %v1649_v2 = vadd.f32 %v1648_v63, %v3248_v25  ;;  %v1650_v3 = vpop.f32.mrb[54].mxu0 }
 0x463   :  { %1775 = vst [vmem:[#allocation5 + $0xa0] sm:$0xff] %v1647_v58  ;;  %v1651_v10 = vadd.f32 %v1650_v3, %v3246_v5  ;;  %v1652_v4 = vpop.f32.mrb[55].mxu0 }
 0x464   :  { %1776 = vst [vmem:[#allocation5 + $0xa8] sm:$0xff] %v1649_v2  ;;  %v1653_v7 = vadd.f32 %v1652_v4, %v3248_v25 }
 0x465   :  { %1777 = vst [vmem:[#allocation5 + $0xb0] sm:$0xff] %v1651_v10 }
 0x466   :  { %1778 = vst [vmem:[#allocation5 + $0xb8] sm:$0xff] %v1653_v7 }
 0x468   :  { %v1656_v9 = vpop.f32.mrb[56].mxu0 }
 0x469   :  { %v1657_v24 = vadd.f32 %v1656_v9, %v3246_v5  ;;  %v1658_v31 = vpop.f32.mrb[57].mxu0 }
 0x46a   :  { %v1659_v13 = vadd.f32 %v1658_v31, %v3248_v25  ;;  %v1660_v15 = vpop.f32.mrb[58].mxu0 }
 0x46b   :  { %1779 = vst [vmem:[#allocation5 + $0xc0] sm:$0xff] %v1657_v24  ;;  %v1661_v50 = vadd.f32 %v1660_v15, %v3246_v5  ;;  %v1662_v16 = vpop.f32.mrb[59].mxu0 }
 0x46c   :  { %1780 = vst [vmem:[#allocation5 + $0xc8] sm:$0xff] %v1659_v13  ;;  %v1663_v18 = vadd.f32 %v1662_v16, %v3248_v25 }
 0x46d   :  { %1781 = vst [vmem:[#allocation5 + $0xd0] sm:$0xff] %v1661_v50 }
 0x46e   :  { %1782 = vst [vmem:[#allocation5 + $0xd8] sm:$0xff] %v1663_v18 }
 0x470   :  { %v1666_v19 = vpop.f32.mrb[60].mxu0 }
 0x471   :  { %v1667_v20 = vadd.f32 %v1666_v19, %v3246_v5  ;;  %v1668_v21 = vpop.f32.mrb[61].mxu0 }
 0x472   :  { %v1669_v23 = vadd.f32 %v1668_v21, %v3248_v25  ;;  %v1670_v8 = vpop.f32.mrb[62].mxu0 }
 0x473   :  { %1783 = vst [vmem:[#allocation5 + $0xe0] sm:$0xff] %v1667_v20  ;;  %v1671_v55 = vadd.f32 %v1670_v8, %v3246_v5  ;;  %v1672_v26 = vpop.f32.mrb[63].mxu0 }
 0x474   :  { %1784 = vst [vmem:[#allocation5 + $0xe8] sm:$0xff] %v1669_v23  ;;  %v1673_v0 = vadd.f32 %v1672_v26, %v3248_v25 }
 0x475   :  { %1785 = vst [vmem:[#allocation5 + $0xf0] sm:$0xff] %v1671_v55 }
 0x476   :  { %1786 = vst [vmem:[#allocation5 + $0xf8] sm:$0xff] %v1673_v0 }
 0x4b3   :  { %v1676_v29 = vpop.f32.mrb[64].mxu0 }
 0x4b4   :  { %v1677_v30 = vadd.f32 %v1676_v29, %v3246_v5  ;;  %v1678_v12 = vpop.f32.mrb[65].mxu0 }
 0x4b5   :  { %v1679_v34 = vadd.f32 %v1678_v12, %v3248_v25  ;;  %v1680_v35 = vpop.f32.mrb[66].mxu0 }
 0x4b6   :  { %1787 = vst [vmem:[#allocation5 + $0x100] sm:$0xff] %v1677_v30  ;;  %v1681_v40 = vadd.f32 %v1680_v35, %v3246_v5  ;;  %v1682_v41 = vpop.f32.mrb[67].mxu0 }
 0x4b7   :  { %1788 = vst [vmem:[#allocation5 + $0x108] sm:$0xff] %v1679_v34  ;;  %v1683_v44 = vadd.f32 %v1682_v41, %v3248_v25 }
 0x4b8   :  { %1789 = vst [vmem:[#allocation5 + $0x110] sm:$0xff] %v1681_v40 }
 0x4b9   :  { %1790 = vst [vmem:[#allocation5 + $0x118] sm:$0xff] %v1683_v44 }
 0x4bb   :  { %v1686_v46 = vpop.f32.mrb[68].mxu0 }
 0x4bc   :  { %v1687_v37 = vadd.f32 %v1686_v46, %v3246_v5  ;;  %v1688_v43 = vpop.f32.mrb[69].mxu0 }
 0x4bd   :  { %v1689_v33 = vadd.f32 %v1688_v43, %v3248_v25  ;;  %v1690_v14 = vpop.f32.mrb[70].mxu0 }
 0x4be   :  { %1791 = vst [vmem:[#allocation5 + $0x120] sm:$0xff] %v1687_v37  ;;  %v1691_v42 = vadd.f32 %v1690_v14, %v3246_v5  ;;  %v1692_v27 = vpop.f32.mrb[71].mxu0 }
 0x4bf   :  { %1792 = vst [vmem:[#allocation5 + $0x128] sm:$0xff] %v1689_v33  ;;  %v1693_v11 = vadd.f32 %v1692_v27, %v3248_v25 }
 0x4c0   :  { %1793 = vst [vmem:[#allocation5 + $0x130] sm:$0xff] %v1691_v42 }
 0x4c1   :  { %1794 = vst [vmem:[#allocation5 + $0x138] sm:$0xff] %v1693_v11 }
 0x4c4   :  { %v1696_v47 = vpop.f32.mrb[72].mxu0 }
 0x4c5   :  { %v1697_v48 = vadd.f32 %v1696_v47, %v3246_v5  ;;  %v1698_v52 = vpop.f32.mrb[73].mxu0 }
 0x4c6   :  { %v1699_v54 = vadd.f32 %v1698_v52, %v3248_v25  ;;  %v1700_v28 = vpop.f32.mrb[74].mxu0 }
 0x4c7   :  { %1795 = vst [vmem:[#allocation5 + $0x140] sm:$0xff] %v1697_v48  ;;  %v1701_v57 = vadd.f32 %v1700_v28, %v3246_v5  ;;  %v1702_v38 = vpop.f32.mrb[75].mxu0 }
 0x4c8   :  { %1796 = vst [vmem:[#allocation5 + $0x148] sm:$0xff] %v1699_v54  ;;  %v1703_v60 = vadd.f32 %v1702_v38, %v3248_v25 }
 0x4c9   :  { %1797 = vst [vmem:[#allocation5 + $0x150] sm:$0xff] %v1701_v57 }
 0x4ca   :  { %1798 = vst [vmem:[#allocation5 + $0x158] sm:$0xff] %v1703_v60 }
 0x4cc   :  { %v1706_v39 = vpop.f32.mrb[76].mxu0 }
 0x4cd   :  { %v1707_v22 = vadd.f32 %v1706_v39, %v3246_v5  ;;  %v1708_v32 = vpop.f32.mrb[77].mxu0 }
 0x4ce   :  { %v1709_v62 = vadd.f32 %v1708_v32, %v3248_v25  ;;  %v1710_v45 = vpop.f32.mrb[78].mxu0 }
 0x4cf   :  { %1799 = vst [vmem:[#allocation5 + $0x160] sm:$0xff] %v1707_v22  ;;  %v1711_v51 = vadd.f32 %v1710_v45, %v3246_v5  ;;  %v1712_v53 = vpop.f32.mrb[79].mxu0 }
 0x4d0   :  { %1800 = vst [vmem:[#allocation5 + $0x168] sm:$0xff] %v1709_v62  ;;  %v1713_v56 = vadd.f32 %v1712_v53, %v3248_v25 }
 0x4d1   :  { %1801 = vst [vmem:[#allocation5 + $0x170] sm:$0xff] %v1711_v51 }
 0x4d2   :  { %1802 = vst [vmem:[#allocation5 + $0x178] sm:$0xff] %v1713_v56 }
 0x4d4   :  { %v1716_v61 = vpop.f32.mrb[80].mxu0 }
 0x4d5   :  { %v1717_v17 = vadd.f32 %v1716_v61, %v3246_v5  ;;  %v1718_v36 = vpop.f32.mrb[81].mxu0 }
 0x4d6   :  { %v1719_v49 = vadd.f32 %v1718_v36, %v3248_v25  ;;  %v1720_v59 = vpop.f32.mrb[82].mxu0 }
 0x4d7   :  { %1803 = vst [vmem:[#allocation5 + $0x180] sm:$0xff] %v1717_v17  ;;  %v1721_v1 = vadd.f32 %v1720_v59, %v3246_v5  ;;  %v1722_v6 = vpop.f32.mrb[83].mxu0 }
 0x4d8   :  { %1804 = vst [vmem:[#allocation5 + $0x188] sm:$0xff] %v1719_v49  ;;  %v1723_v58 = vadd.f32 %v1722_v6, %v3248_v25 }
 0x4d9   :  { %1805 = vst [vmem:[#allocation5 + $0x190] sm:$0xff] %v1721_v1 }
 0x4da   :  { %1806 = vst [vmem:[#allocation5 + $0x198] sm:$0xff] %v1723_v58 }
 0x4dc   :  { %v1726_v63 = vpop.f32.mrb[84].mxu0 }
 0x4dd   :  { %v1727_v2 = vadd.f32 %v1726_v63, %v3246_v5  ;;  %v1728_v3 = vpop.f32.mrb[85].mxu0 }
 0x4de   :  { %v1729_v10 = vadd.f32 %v1728_v3, %v3248_v25  ;;  %v1730_v4 = vpop.f32.mrb[86].mxu0 }
 0x4df   :  { %1807 = vst [vmem:[#allocation5 + $0x1a0] sm:$0xff] %v1727_v2  ;;  %v1731_v7 = vadd.f32 %v1730_v4, %v3246_v5  ;;  %v1732_v9 = vpop.f32.mrb[87].mxu0 }
 0x4e0   :  { %1808 = vst [vmem:[#allocation5 + $0x1a8] sm:$0xff] %v1729_v10  ;;  %v1733_v24 = vadd.f32 %v1732_v9, %v3248_v25 }
 0x4e1   :  { %1809 = vst [vmem:[#allocation5 + $0x1b0] sm:$0xff] %v1731_v7 }
 0x4e2   :  { %1810 = vst [vmem:[#allocation5 + $0x1b8] sm:$0xff] %v1733_v24 }
 0x4e4   :  { %v1736_v31 = vpop.f32.mrb[88].mxu0 }
 0x4e5   :  { %v1737_v13 = vadd.f32 %v1736_v31, %v3246_v5  ;;  %v1738_v15 = vpop.f32.mrb[89].mxu0 }
 0x4e6   :  { %v1739_v50 = vadd.f32 %v1738_v15, %v3248_v25  ;;  %v1740_v16 = vpop.f32.mrb[90].mxu0 }
 0x4e7   :  { %1811 = vst [vmem:[#allocation5 + $0x1c0] sm:$0xff] %v1737_v13  ;;  %v1741_v18 = vadd.f32 %v1740_v16, %v3246_v5  ;;  %v1742_v19 = vpop.f32.mrb[91].mxu0 }
 0x4e8   :  { %1812 = vst [vmem:[#allocation5 + $0x1c8] sm:$0xff] %v1739_v50  ;;  %v1743_v20 = vadd.f32 %v1742_v19, %v3248_v25 }
 0x4e9   :  { %1813 = vst [vmem:[#allocation5 + $0x1d0] sm:$0xff] %v1741_v18 }
 0x4ea   :  { %1814 = vst [vmem:[#allocation5 + $0x1d8] sm:$0xff] %v1743_v20 }
 0x4ec   :  { %v1746_v21 = vpop.f32.mrb[92].mxu0 }
 0x4ed   :  { %v1747_v23 = vadd.f32 %v1746_v21, %v3246_v5  ;;  %v1748_v8 = vpop.f32.mrb[93].mxu0 }
 0x4ee   :  { %v1749_v55 = vadd.f32 %v1748_v8, %v3248_v25  ;;  %v1750_v26 = vpop.f32.mrb[94].mxu0 }
 0x4ef   :  { %1815 = vst [vmem:[#allocation5 + $0x1e0] sm:$0xff] %v1747_v23  ;;  %v1751_v0 = vadd.f32 %v1750_v26, %v3246_v5  ;;  %v1752_v29 = vpop.f32.mrb[95].mxu0 }
 0x4f0   :  { %1816 = vst [vmem:[#allocation5 + $0x1e8] sm:$0xff] %v1749_v55  ;;  %v1753_v30 = vadd.f32 %v1752_v29, %v3248_v25 }
 0x4f1   :  { %1817 = vst [vmem:[#allocation5 + $0x1f0] sm:$0xff] %v1751_v0 }
 0x4f2   :  { %1818 = vst [vmem:[#allocation5 + $0x1f8] sm:$0xff] %v1753_v30 }
 0x4f3   :  { %2414 = shalt.err (!%p2411_p12)
}
 0x4f4   :  { %s2415_s24 = scalar_lea.hbm %s3339_s10, 8192 }
 0x4f5   :  { %p2416_p13 = scmp.ne.s32.totalorder %s3339_s10, %s2415_s24  ;;  %p2419_p0 = scmp.lt.u32.totalorder %s2415_s24, %s3339_s10 }
 0x4f7   :  { %p2421_p1 = pnand %p2419_p0, %p2416_p13 }
 0x4f9   :  { %2424 = shalt.err (!%p2421_p1)
}
 0x4fa   :  { %1862 = dma.vmem_to_hbm [thread:$0]  %s1857_s18, 8192, %s3339_s10, [#allocation4], %s2430_s27, %s2430_s27, %s2431_s28  }
 0x4fb   :  { %2427 = dma.done.wait [#allocation4], 8192  }
 0x4fc   :  { %2428 = vsyncadd [#allocation4], 4294959104 }
 0x4fd   :  { %1870 = vsyncpa [#allocation3], 1 }
 0x4fe   :  { %1871 = vsyncpa [#allocation4], 1 }

</bundles_post_ra>
